<compile_context>
chip_gen: v6e
topology: v6e:2x2x1
jax: 0.10.0
libtpu: 0.0.40
codegen_flags: <defaults>
</compile_context>

<pallas_src>
import math

import jax
import jax.numpy as jnp
from jax.experimental import pallas as pl
from jax.experimental.pallas import tpu as pltpu

# ----------------------------- small synthetic config -----------------------------
EMBED_DIM = 32          # CLIP embed dim (== text width, as in PMC-CLIP)
IMG_SIZE = 16
PATCH = 8
V_WIDTH = 32
V_LAYERS = 2
V_HEADS = 4
T_WIDTH = 32
T_LAYERS = 2
T_HEADS = 4
CTX_LEN = 8             # text context length
VOCAB = 64
VOCAB_PAD = 128         # lane-dense MLM output width (sliced back to VOCAB outside)
FUSION_LAYERS = 1
MLP_RATIO = 4
CLS_ID = 2              # [CLS] token id (matches self.cls_id = 2 in the module)

_TOWER_PARAM_NAMES = ["ln1_g", "ln1_b", "in_w", "in_b", "out_w", "out_b",
                      "ln2_g", "ln2_b", "fc_w", "fc_b", "proj_w", "proj_b"]


# ============================ in-kernel helper functions ===========================

def _ln(x, g, b):
    mu = jnp.mean(x, axis=-1, keepdims=True)
    var = jnp.mean((x - mu) ** 2, axis=-1, keepdims=True)
    return (x - mu) * jax.lax.rsqrt(var + 1e-5) * g + b


def _gelu(x):
    # TODO(synk): nn.GELU uses exact erf; Mosaic-safe tanh approximation used here.
    c = math.sqrt(2.0 / math.pi)
    return 0.5 * x * (1.0 + jnp.tanh(c * (x + 0.044715 * x * x * x)))


def _l2_normalize(f):
    n = jnp.sqrt(jnp.sum(f * f, axis=-1, keepdims=True))
    return f / jnp.maximum(n, 1e-12)


def _tower_block(x, ln1_g, ln1_b, in_w, in_b, out_w, out_b,
                 ln2_g, ln2_b, fc_w, fc_b, proj_w, proj_b, *, B, L, heads):
    """One fused ResidualAttentionBlock on the whole batch.  x: (B*L, D)."""
    D = x.shape[-1]
    Dh = D // heads
    scale = 1.0 / math.sqrt(Dh)

    # --- attention branch: LN1 -> QKV (batched) -> per-(batch,head) SDPA ---
    h = _ln(x, ln1_g, ln1_b)
    qkv = jnp.dot(h, in_w, preferred_element_type=jnp.float32) + in_b      # (B*L, 3D)

    outs = []
    for b in range(B):                                # static unroll over batch
        qkv_b = qkv[b * L:(b + 1) * L]
        q = qkv_b[:, 0:D]
        k = qkv_b[:, D:2 * D]
        v = qkv_b[:, 2 * D:3 * D]
        head_outs = []
        for hh in range(heads):                       # static unroll over heads
            lo, hi = hh * Dh, (hh + 1) * Dh
            s = jax.lax.dot_general(q[:, lo:hi], k[:, lo:hi],
                                    (((1,), (1,)), ((), ())),
                                    preferred_element_type=jnp.float32) * scale
            m = jnp.max(s, axis=-1, keepdims=True)
            p = jnp.exp(s - m)
            p = p * pl.reciprocal(jnp.sum(p, axis=-1, keepdims=True), approx=True)
            head_outs.append(jnp.dot(p, v[:, lo:hi],
                                     preferred_element_type=jnp.float32))
        outs.append(jnp.concatenate(head_outs, axis=-1))                   # (L, D)
    o = jnp.concatenate(outs, axis=0)                                      # (B*L, D)
    # single K=D out-projection matmul over the whole batch (no per-head matmuls)
    x = x + jnp.dot(o, out_w, preferred_element_type=jnp.float32) + out_b

    # --- MLP branch: LN2 -> FC -> GELU -> proj -> residual ---
    h2 = _ln(x, ln2_g, ln2_b)
    h2 = jnp.dot(h2, fc_w, preferred_element_type=jnp.float32) + fc_b
    h2 = _gelu(h2)
    x = x + jnp.dot(h2, proj_w, preferred_element_type=jnp.float32) + proj_b
    return x


# =============================== vision tower kernel ===============================

def _make_vision_kernel(B, Np, Lv, heads, nl):
    def kernel(patch_ref, conv_w, cls_emb, pos_emb, lnpre_g, lnpre_b,
               ln1_g, ln1_b, in_w, in_b, out_w, out_b,
               ln2_g, ln2_b, fc_w, fc_b, proj_w, proj_b,
               lnpost_g, lnpost_b, head_proj,
               feat_ref, xs):
        l = pl.program_id(0)

        @pl.when(l == 0)
        def _():
            # fused ViT stem: conv-as-matmul over all B*Np patches at once, then
            # per-batch [cls | patches] + positional embedding + ln_pre -> VMEM.
            pe = jnp.dot(patch_ref[...], conv_w[...],
                         preferred_element_type=jnp.float32)        # (B*Np, W)
            for b in range(B):
                rows = jnp.concatenate(
                    [cls_emb[...], pe[b * Np:(b + 1) * Np]], axis=0) + pos_emb[...]
                xs[b * Lv:(b + 1) * Lv] = _ln(rows, lnpre_g[...], lnpre_b[...])

        x = _tower_block(
            xs[...],
            ln1_g[0], ln1_b[0], in_w[0], in_b[0], out_w[0], out_b[0],
            ln2_g[0], ln2_b[0], fc_w[0], fc_b[0], proj_w[0], proj_b[0],
            B=B, L=Lv, heads=heads)
        xs[...] = x                       # activation stays resident across layers

        @pl.when(l == nl - 1)
        def _():
            # fused image head: ln_post on CLS rows -> projection -> L2 normalize
            cls_rows = jnp.concatenate(
                [x[b * Lv:b * Lv + 1] for b in range(B)], axis=0)          # (B, W)
            f = jnp.dot(_ln(cls_rows, lnpost_g[...], lnpost_b[...]), head_proj[...],
                        preferred_element_type=jnp.float32)
            feat_ref[...] = _l2_normalize(f)
    return kernel


def encode_image(images, p):
    """VisualTransformer path.  images: NCHW [B, 3, H, W].  One pallas_call."""
    B, C, H, W_img = images.shape
    gh, gw = H // PATCH, W_img // PATCH
    Np = gh * gw
    Lv = Np + 1
    CPP = C * PATCH * PATCH
    blk = p["blocks"]
    nl = blk["in_w"].shape[0]

    # patchify (pure layout glue in XLA); flattened to (B*Np, CPP) so the single
    # stem matmul fills the sublanes.
    patches = images.reshape(B, C, gh, PATCH, gw, PATCH)
    patches = patches.transpose(0, 2, 4, 1, 3, 5).reshape(B * Np, CPP)
    cls2d = p["class_embedding"].reshape(1, V_WIDTH)

    def cspec(arr):   # constant across the layer grid -> fetched once
        n = arr.ndim
        return pl.BlockSpec(arr.shape, lambda l, _n=n: (0,) * _n)

    def wspec(arr):   # per-layer weight, streamed once per layer
        tail = arr.shape[1:]
        n = len(tail)
        return pl.BlockSpec((1,) + tail, lambda l, _n=n: (l,) + (0,) * _n)

    consts = [patches, p["conv_w"], cls2d, p["pos_embed"], p["ln_pre_g"], p["ln_pre_b"]]
    layer_ws = [blk[nm] for nm in _TOWER_PARAM_NAMES]
    head_ws = [p["ln_post_g"], p["ln_post_b"], p["proj"]]

    feats = pl.pallas_call(
        _make_vision_kernel(B, Np, Lv, V_HEADS, nl),
        grid=(nl,),
        in_specs=[cspec(a) for a in consts] + [wspec(a) for a in layer_ws]
                 + [cspec(a) for a in head_ws],
        out_specs=pl.BlockSpec((B, EMBED_DIM), lambda l: (0, 0)),
        out_shape=jax.ShapeDtypeStruct((B, EMBED_DIM), jnp.float32),
        scratch_shapes=[pltpu.VMEM((B * Lv, V_WIDTH), jnp.float32)],
        compiler_params=pltpu.CompilerParams(dimension_semantics=("arbitrary",)),
    )(*consts, *layer_ws, *head_ws)
    return {"image_features": feats}      # already L2-normalized (fused F.normalize)


# ================================ text tower kernel ================================

def _make_text_kernel(B, L, heads, nl):
    def kernel(cls_pos_ref, x_ref,
               ln1_g, ln1_b, in_w, in_b, out_w, out_b,
               ln2_g, ln2_b, fc_w, fc_b, proj_w, proj_b,
               txt_proj,
               x_out_ref, feat_ref, xs):
        l = pl.program_id(0)

        @pl.when(l == 0)
        def _():
            xs[...] = x_ref[...]          # (B*L, D) embeddings

        x = _tower_block(
            xs[...],
            ln1_g[0], ln1_b[0], in_w[0], in_b[0], out_w[0], out_b[0],
            ln2_g[0], ln2_b[0], fc_w[0], fc_b[0], proj_w[0], proj_b[0],
            B=B, L=L, heads=heads)
        xs[...] = x

        @pl.when(l == nl - 1)
        def _():
            x_out_ref[...] = x
            # fused text head: CLS-token gather (scalar-prefetched positions)
            #                  -> text_projection -> L2 normalize
            rows = []
            for b in range(B):
                idx = b * L + cls_pos_ref[b]
                rows.append(xs[pl.ds(idx, 1), :])
            cls_feat = jnp.concatenate(rows, axis=0)                       # (B, D)
            f = jnp.dot(cls_feat, txt_proj[...], preferred_element_type=jnp.float32)
            feat_ref[...] = _l2_normalize(f)
    return kernel


def text_tower(x_emb_flat, cls_pos, blocks, txt_proj, B, L, heads):
    D = x_emb_flat.shape[-1]
    E = txt_proj.shape[-1]
    nl = blocks["in_w"].shape[0]

    def cspec(arr):
        n = arr.ndim
        return pl.BlockSpec(arr.shape, lambda l, s, _n=n: (0,) * _n)

    def wspec(arr):
        tail = arr.shape[1:]
        n = len(tail)
        return pl.BlockSpec((1,) + tail, lambda l, s, _n=n: (l,) + (0,) * _n)

    layer_ws = [blocks[nm] for nm in _TOWER_PARAM_NAMES]

    x_out, feats = pl.pallas_call(
        _make_text_kernel(B, L, heads, nl),
        grid_spec=pltpu.PrefetchScalarGridSpec(
            num_scalar_prefetch=1,
            grid=(nl,),
            in_specs=[cspec(x_emb_flat)] + [wspec(a) for a in layer_ws]
                     + [cspec(txt_proj)],
            out_specs=[pl.BlockSpec((B * L, D), lambda l, s: (0, 0)),
                       pl.BlockSpec((B, E), lambda l, s: (0, 0))],
            scratch_shapes=[pltpu.VMEM((B * L, D), jnp.float32)]),
        out_shape=(jax.ShapeDtypeStruct((B * L, D), jnp.float32),
                   jax.ShapeDtypeStruct((B, E), jnp.float32)),
        compiler_params=pltpu.CompilerParams(dimension_semantics=("arbitrary",)),
    )(cls_pos, x_emb_flat, *layer_ws, txt_proj)
    return x_out, feats


# =============================== fusion tower kernel ===============================

def _make_fusion_kernel(B, L, Lf, vocab, heads, nl):
    def kernel(x_ref, spc_ref, img_ref,
               ln1_g, ln1_b, in_w, in_b, out_w, out_b,
               ln2_g, ln2_b, fc_w, fc_b, proj_w, proj_b,
               mlm_w,
               pred_ref, xs):
        l = pl.program_id(0)

        @pl.when(l == 0)
        def _():
            # assemble [text tokens | img_special_token | image_features] in-kernel
            for b in range(B):
                base = b * Lf
                xs[base:base + L] = x_ref[b * L:(b + 1) * L]
                xs[base + L:base + L + 1] = spc_ref[...]
                xs[base + L + 1:base + L + 2] = img_ref[b:b + 1]

        x = _tower_block(
            xs[...],
            ln1_g[0], ln1_b[0], in_w[0], in_b[0], out_w[0], out_b[0],
            ln2_g[0], ln2_b[0], fc_w[0], fc_b[0], proj_w[0], proj_b[0],
            B=B, L=Lf, heads=heads)
        xs[...] = x

        @pl.when(l == nl - 1)
        def _():
            # drop the 2 appended image rows, then fused MLM head:
            # x @ mlm_projection (vocab padded to lane-dense 128) + masked log-softmax
            rows = jnp.concatenate([x[b * Lf:b * Lf + L] for b in range(B)], axis=0)
            logits = jnp.dot(rows, mlm_w[...], preferred_element_type=jnp.float32)
            lane = jax.lax.broadcasted_iota(jnp.int32, logits.shape, 1)
            valid = lane < vocab
            logits = jnp.where(valid, logits, -1e30)
            m = jnp.max(logits, axis=-1, keepdims=True)
            s = logits - m
            denom = jnp.sum(jnp.where(valid, jnp.exp(s), 0.0), axis=-1, keepdims=True)
            pred_ref[...] = s - jnp.log(denom)
    return kernel


def fusion_tower(x_flat, img_special, image_features, blocks, mlm_pad, B, L, heads):
    D = x_flat.shape[-1]
    Lf = L + 2
    nl = blocks["in_w"].shape[0]

    def cspec(arr):
        n = arr.ndim
        return pl.BlockSpec(arr.shape, lambda l, _n=n: (0,) * _n)

    def wspec(arr):
        tail = arr.shape[1:]
        n = len(tail)
        return pl.BlockSpec((1,) + tail, lambda l, _n=n: (l,) + (0,) * _n)

    layer_ws = [blocks[nm] for nm in _TOWER_PARAM_NAMES]

    return pl.pallas_call(
        _make_fusion_kernel(B, L, Lf, VOCAB, heads, nl),
        grid=(nl,),
        in_specs=[cspec(x_flat), cspec(img_special), cspec(image_features)]
                 + [wspec(a) for a in layer_ws] + [cspec(mlm_pad)],
        out_specs=pl.BlockSpec((B * L, VOCAB_PAD), lambda l: (0, 0)),
        out_shape=jax.ShapeDtypeStruct((B * L, VOCAB_PAD), jnp.float32),
        scratch_shapes=[pltpu.VMEM((B * Lf, D), jnp.float32)],
        compiler_params=pltpu.CompilerParams(dimension_semantics=("arbitrary",)),
    )(x_flat, img_special, image_features, *layer_ws, mlm_pad)


# ================================== model forward ==================================

def encode_text(params, input_ids, bert_label, image_features):
    B, L = input_ids.shape
    te = params["text_encoder"]
    # TODO(synk): HF BiomedBERT (pretrained) has no Pallas equivalent; replaced by a
    # deterministic synthetic transformer with the same last_hidden_state interface.
    x_emb = (te["tok_emb"][input_ids] + te["pos_emb"][None]).reshape(B * L, T_WIDTH)
    # CLS-token positions (cls_id == 2); scalar-prefetched into SMEM for the gather.
    cls_pos = jnp.argmax((input_ids == CLS_ID).astype(jnp.int32), axis=1).astype(jnp.int32)

    # text encoder + fused (CLS gather -> text_projection -> normalize) head
    x_flat, text_features = text_tower(x_emb, cls_pos, te["blocks"],
                                       params["text_projection"], B, L, T_HEADS)

    # fusion tower with in-kernel input assembly and fused MLM head (lane-dense out)
    mlm_pad = jnp.pad(params["mlm_projection"], ((0, 0), (0, VOCAB_PAD - VOCAB)))
    pred_pad = fusion_tower(x_flat, params["img_special_token"].reshape(1, EMBED_DIM),
                            image_features, params["fusion"], mlm_pad, B, L, T_HEADS)
    bert_prediction = pred_pad.reshape(B, L, VOCAB_PAD)[:, :, :VOCAB]

    return {
        "text_features": text_features,
        "bert_prediction": bert_prediction,
        "attentions": None,
        "encoded_label": bert_label,
    }


def pmc_clip_forward(params, batch):
    image_features = encode_image(batch["images"], params["visual"])["image_features"]
    text_output = encode_text(params, batch["bert_input"], batch["bert_label"],
                              image_features)
    return {
        "image_features": image_features,
        "text_features": text_output["text_features"],
        "logit_scale": jnp.exp(params["logit_scale"]),
        "bert_label": text_output["encoded_label"],
        "bert_prediction": text_output["bert_prediction"],
        "attentions": None,
    }


# ================================ parameter init ===================================

def init_params():
    key = jax.random.PRNGKey(0)
    counter = [0]

    def nk():
        counter[0] += 1
        return jax.random.fold_in(key, counter[0])

    def nrm(shape, std=0.02):
        return std * jax.random.normal(nk(), shape, dtype=jnp.float32)

    def block_params(width, mlp_ratio=MLP_RATIO):
        hidden = width * mlp_ratio
        # NOTE: real nn.MultiheadAttention stores in_proj_weight as [3D, D] used as
        # x @ W^T; synthetic weights here are stored pre-transposed as [D, 3D].
        return dict(
            ln1_g=jnp.ones((1, width), jnp.float32), ln1_b=jnp.zeros((1, width), jnp.float32),
            in_w=nrm((width, 3 * width), width ** -0.5), in_b=jnp.zeros((1, 3 * width), jnp.float32),
            out_w=nrm((width, width), width ** -0.5), out_b=jnp.zeros((1, width), jnp.float32),
            ln2_g=jnp.ones((1, width), jnp.float32), ln2_b=jnp.zeros((1, width), jnp.float32),
            fc_w=nrm((width, hidden), width ** -0.5), fc_b=jnp.zeros((1, hidden), jnp.float32),
            proj_w=nrm((hidden, width), hidden ** -0.5), proj_b=jnp.zeros((1, width), jnp.float32),
        )

    def stack_blocks(width, n_layers):
        blocks = [block_params(width) for _ in range(n_layers)]
        return {k: jnp.stack([b[k] for b in blocks], axis=0) for k in blocks[0]}

    n_patches = (IMG_SIZE // PATCH) ** 2
    visual = dict(
        conv_w=nrm((3 * PATCH * PATCH, V_WIDTH), V_WIDTH ** -0.5),
        class_embedding=nrm((V_WIDTH,), V_WIDTH ** -0.5),
        pos_embed=nrm((n_patches + 1, V_WIDTH), V_WIDTH ** -0.5),
        ln_pre_g=jnp.ones((1, V_WIDTH), jnp.float32), ln_pre_b=jnp.zeros((1, V_WIDTH), jnp.float32),
        blocks=stack_blocks(V_WIDTH, V_LAYERS),
        ln_post_g=jnp.ones((1, V_WIDTH), jnp.float32), ln_post_b=jnp.zeros((1, V_WIDTH), jnp.float32),
        proj=nrm((V_WIDTH, EMBED_DIM), V_WIDTH ** -0.5),
    )
    text_encoder = dict(
        tok_emb=nrm((VOCAB, T_WIDTH), 0.02),
        pos_emb=nrm((CTX_LEN, T_WIDTH), 0.01),
        blocks=stack_blocks(T_WIDTH, T_LAYERS),
    )
    return dict(
        visual=visual,
        text_encoder=text_encoder,
        # positional_embedding / ln_final / attn_mask are unused in the BERT-style
        # forward path of the reference module (kept here for parameter fidelity).
        positional_embedding=nrm((CTX_LEN, T_WIDTH), 0.01),
        text_projection=nrm((T_WIDTH, EMBED_DIM), T_WIDTH ** -0.5),
        mlm_projection=nrm((T_WIDTH, VOCAB), T_WIDTH ** -0.5),
        logit_scale=jnp.asarray(math.log(1.0 / 0.07), jnp.float32),
        img_special_token=jnp.zeros((1, 1, EMBED_DIM), jnp.float32),
        fusion=stack_blocks(T_WIDTH, FUSION_LAYERS),
    )


# ===================================== main ========================================

if __name__ == "__main__":
    params = init_params()

    key = jax.random.PRNGKey(0)
    k_img, k_ids, k_lbl = jax.random.split(key, 3)
    B = 2
    images = jax.random.normal(k_img, (B, 3, IMG_SIZE, IMG_SIZE), jnp.float32)
    body = jax.random.randint(k_ids, (B, CTX_LEN - 1), 3, VOCAB, dtype=jnp.int32)
    input_ids = jnp.concatenate([jnp.full((B, 1), CLS_ID, jnp.int32), body], axis=1)
    bert_label = jax.random.randint(k_lbl, (B, CTX_LEN), 0, VOCAB, dtype=jnp.int32)

    batch = {"images": images, "bert_input": input_ids, "bert_label": bert_label}

    out = pmc_clip_forward(params, batch)
    out = jax.block_until_ready(out)

    assert out["image_features"].shape == (B, EMBED_DIM)
    assert out["text_features"].shape == (B, EMBED_DIM)
    assert out["bert_prediction"].shape == (B, CTX_LEN, VOCAB)
    assert out["logit_scale"].shape == ()

    print("KERNEL_OK")
</pallas_src>

<mosaic_0001>
module attributes {stable_mosaic.version = 11 : i64} {
  func.func @kernel(%arg0: i32, %arg1: memref<8x192xf32, #tpu.memory_space<vmem>>, %arg2: memref<192x32xf32, #tpu.memory_space<vmem>>, %arg3: memref<1x32xf32, #tpu.memory_space<vmem>>, %arg4: memref<5x32xf32, #tpu.memory_space<vmem>>, %arg5: memref<1x32xf32, #tpu.memory_space<vmem>>, %arg6: memref<1x32xf32, #tpu.memory_space<vmem>>, %arg7: memref<1x1x32xf32, #tpu.memory_space<vmem>>, %arg8: memref<1x1x32xf32, #tpu.memory_space<vmem>>, %arg9: memref<1x32x96xf32, #tpu.memory_space<vmem>>, %arg10: memref<1x1x96xf32, #tpu.memory_space<vmem>>, %arg11: memref<1x32x32xf32, #tpu.memory_space<vmem>>, %arg12: memref<1x1x32xf32, #tpu.memory_space<vmem>>, %arg13: memref<1x1x32xf32, #tpu.memory_space<vmem>>, %arg14: memref<1x1x32xf32, #tpu.memory_space<vmem>>, %arg15: memref<1x32x128xf32, #tpu.memory_space<vmem>>, %arg16: memref<1x1x128xf32, #tpu.memory_space<vmem>>, %arg17: memref<1x128x32xf32, #tpu.memory_space<vmem>>, %arg18: memref<1x1x32xf32, #tpu.memory_space<vmem>>, %arg19: memref<1x32xf32, #tpu.memory_space<vmem>>, %arg20: memref<1x32xf32, #tpu.memory_space<vmem>>, %arg21: memref<32x32xf32, #tpu.memory_space<vmem>>, %arg22: memref<2x32xf32, #tpu.memory_space<vmem>>, %arg23: memref<10x32xf32, #tpu.memory_space<vmem>>) attributes {dimension_semantics = [#tpu.dimension_semantics<arbitrary>], iteration_bounds = array<i64: 2>, scalar_prefetch = 0 : i64, scratch_operands = 1 : i64, tpu.core_type = #tpu.core_type<tc>, window_params = [{pipeline_mode = #tpu.pipeline_mode<synchronous>, transform_indices = @transform_0, window_bounds = array<i64: 8, 192>}, {pipeline_mode = #tpu.pipeline_mode<synchronous>, transform_indices = @transform_1, window_bounds = array<i64: 192, 32>}, {pipeline_mode = #tpu.pipeline_mode<synchronous>, transform_indices = @transform_2, window_bounds = array<i64: 1, 32>}, {pipeline_mode = #tpu.pipeline_mode<synchronous>, transform_indices = @transform_3, window_bounds = array<i64: 5, 32>}, {pipeline_mode = #tpu.pipeline_mode<synchronous>, transform_indices = @transform_4, window_bounds = array<i64: 1, 32>}, {pipeline_mode = #tpu.pipeline_mode<synchronous>, transform_indices = @transform_5, window_bounds = array<i64: 1, 32>}, {transform_indices = @transform_6, window_bounds = array<i64: 1, 1, 32>}, {transform_indices = @transform_7, window_bounds = array<i64: 1, 1, 32>}, {transform_indices = @transform_8, window_bounds = array<i64: 1, 32, 96>}, {transform_indices = @transform_9, window_bounds = array<i64: 1, 1, 96>}, {transform_indices = @transform_10, window_bounds = array<i64: 1, 32, 32>}, {transform_indices = @transform_11, window_bounds = array<i64: 1, 1, 32>}, {transform_indices = @transform_12, window_bounds = array<i64: 1, 1, 32>}, {transform_indices = @transform_13, window_bounds = array<i64: 1, 1, 32>}, {transform_indices = @transform_14, window_bounds = array<i64: 1, 32, 128>}, {transform_indices = @transform_15, window_bounds = array<i64: 1, 1, 128>}, {transform_indices = @transform_16, window_bounds = array<i64: 1, 128, 32>}, {transform_indices = @transform_17, window_bounds = array<i64: 1, 1, 32>}, {pipeline_mode = #tpu.pipeline_mode<synchronous>, transform_indices = @transform_18, window_bounds = array<i64: 1, 32>}, {pipeline_mode = #tpu.pipeline_mode<synchronous>, transform_indices = @transform_19, window_bounds = array<i64: 1, 32>}, {pipeline_mode = #tpu.pipeline_mode<synchronous>, transform_indices = @transform_20, window_bounds = array<i64: 32, 32>}, {pipeline_mode = #tpu.pipeline_mode<synchronous>, transform_indices = @transform_21, window_bounds = array<i64: 2, 32>}]} {
    %c0_i32 = arith.constant 0 : i32
    %0 = arith.cmpi eq, %arg0, %c0_i32 : i32
    %1 = arith.extui %0 : i1 to i32
    %c0_i32_0 = arith.constant 0 : i32
    %2 = arith.cmpi ne, %1, %c0_i32_0 : i32
    scf.if %2 {
      %c0_98 = arith.constant 0 : index
      %c0_99 = arith.constant 0 : index
      %250 = vector.load %arg1[%c0_98, %c0_99] : memref<8x192xf32, #tpu.memory_space<vmem>>, vector<8x192xf32>
      %c0_100 = arith.constant 0 : index
      %c0_101 = arith.constant 0 : index
      %251 = vector.load %arg2[%c0_100, %c0_101] : memref<192x32xf32, #tpu.memory_space<vmem>>, vector<192x32xf32>
      %cst_102 = arith.constant dense<0.000000e+00> : vector<8x32xf32>
      %252 = tpu.matmul %250, %251, %cst_102 {dimension_numbers = #tpu.dot_dimension_numbers<[1], [0], [0], [1], [0, 0, 1, 1], [], []>} : vector<8x192xf32>, vector<192x32xf32>, vector<8x32xf32> -> vector<8x32xf32>
      %c0_103 = arith.constant 0 : index
      %c0_104 = arith.constant 0 : index
      %253 = vector.load %arg3[%c0_103, %c0_104] : memref<1x32xf32, #tpu.memory_space<vmem>>, vector<1x32xf32>
      %254 = vector.extract_strided_slice %252 {offsets = [0, 0], sizes = [4, 32], strides = [1, 1]} : vector<8x32xf32> to vector<4x32xf32>
      %255 = tpu.concatenate %253, %254 in 0 : vector<1x32xf32>, vector<4x32xf32> -> vector<5x32xf32>
      %c0_105 = arith.constant 0 : index
      %c0_106 = arith.constant 0 : index
      %256 = vector.load %arg4[%c0_105, %c0_106] : memref<5x32xf32, #tpu.memory_space<vmem>>, vector<5x32xf32>
      %257 = arith.addf %255, %256 : vector<5x32xf32>
      %c0_107 = arith.constant 0 : index
      %c0_108 = arith.constant 0 : index
      %258 = vector.load %arg5[%c0_107, %c0_108] : memref<1x32xf32, #tpu.memory_space<vmem>>, vector<1x32xf32>
      %c0_109 = arith.constant 0 : index
      %c0_110 = arith.constant 0 : index
      %259 = vector.load %arg6[%c0_109, %c0_110] : memref<1x32xf32, #tpu.memory_space<vmem>>, vector<1x32xf32>
      %cst_111 = arith.constant dense<0.000000e+00> : vector<5xf32>
      %260 = vector.multi_reduction <add>, %257, %cst_111 [1] : vector<5x32xf32> to vector<5xf32>
      %261 = vector.shape_cast %260 : vector<5xf32> to vector<5x1xf32>
      %cst_112 = arith.constant 3.200000e+01 : f32
      %262 = vector.broadcast %cst_112 : f32 to vector<5x1xf32>
      %263 = arith.divf %261, %262 : vector<5x1xf32>
      %264 = vector.broadcast %263 : vector<5x1xf32> to vector<5x32xf32>
      %265 = arith.subf %257, %264 : vector<5x32xf32>
      %266 = arith.mulf %265, %265 : vector<5x32xf32>
      %cst_113 = arith.constant dense<0.000000e+00> : vector<5xf32>
      %267 = vector.multi_reduction <add>, %266, %cst_113 [1] : vector<5x32xf32> to vector<5xf32>
      %268 = vector.shape_cast %267 : vector<5xf32> to vector<5x1xf32>
      %cst_114 = arith.constant 3.200000e+01 : f32
      %269 = vector.broadcast %cst_114 : f32 to vector<5x1xf32>
      %270 = arith.divf %268, %269 : vector<5x1xf32>
      %271 = vector.broadcast %263 : vector<5x1xf32> to vector<5x32xf32>
      %272 = arith.subf %257, %271 : vector<5x32xf32>
      %cst_115 = arith.constant 9.99999974E-6 : f32
      %273 = vector.broadcast %cst_115 : f32 to vector<5x1xf32>
      %274 = arith.addf %270, %273 : vector<5x1xf32>
      %275 = math.rsqrt %274 : vector<5x1xf32>
      %276 = vector.broadcast %275 : vector<5x1xf32> to vector<5x32xf32>
      %277 = arith.mulf %272, %276 : vector<5x32xf32>
      %278 = vector.broadcast %258 : vector<1x32xf32> to vector<5x32xf32>
      %279 = arith.mulf %277, %278 : vector<5x32xf32>
      %280 = vector.broadcast %259 : vector<1x32xf32> to vector<5x32xf32>
      %281 = arith.addf %279, %280 : vector<5x32xf32>
      %c0_116 = arith.constant 0 : index
      %c0_117 = arith.constant 0 : index
      %282 = vector.load %arg23[%c0_116, %c0_117] : memref<10x32xf32, #tpu.memory_space<vmem>>, vector<5x32xf32>
      tpu.vector_store %arg23[%c0_116, %c0_117], %281 {strides = array<i32>} : memref<10x32xf32, #tpu.memory_space<vmem>>, vector<5x32xf32>,
      %c0_118 = arith.constant 0 : index
      %c0_119 = arith.constant 0 : index
      %283 = vector.load %arg3[%c0_118, %c0_119] : memref<1x32xf32, #tpu.memory_space<vmem>>, vector<1x32xf32>
      %284 = vector.extract_strided_slice %252 {offsets = [4, 0], sizes = [4, 32], strides = [1, 1]} : vector<8x32xf32> to vector<4x32xf32>
      %285 = tpu.concatenate %283, %284 in 0 : vector<1x32xf32>, vector<4x32xf32> -> vector<5x32xf32>
      %c0_120 = arith.constant 0 : index
      %c0_121 = arith.constant 0 : index
      %286 = vector.load %arg4[%c0_120, %c0_121] : memref<5x32xf32, #tpu.memory_space<vmem>>, vector<5x32xf32>
      %287 = arith.addf %285, %286 : vector<5x32xf32>
      %c0_122 = arith.constant 0 : index
      %c0_123 = arith.constant 0 : index
      %288 = vector.load %arg5[%c0_122, %c0_123] : memref<1x32xf32, #tpu.memory_space<vmem>>, vector<1x32xf32>
      %c0_124 = arith.constant 0 : index
      %c0_125 = arith.constant 0 : index
      %289 = vector.load %arg6[%c0_124, %c0_125] : memref<1x32xf32, #tpu.memory_space<vmem>>, vector<1x32xf32>
      %cst_126 = arith.constant dense<0.000000e+00> : vector<5xf32>
      %290 = vector.multi_reduction <add>, %287, %cst_126 [1] : vector<5x32xf32> to vector<5xf32>
      %291 = vector.shape_cast %290 : vector<5xf32> to vector<5x1xf32>
      %cst_127 = arith.constant 3.200000e+01 : f32
      %292 = vector.broadcast %cst_127 : f32 to vector<5x1xf32>
      %293 = arith.divf %291, %292 : vector<5x1xf32>
      %294 = vector.broadcast %293 : vector<5x1xf32> to vector<5x32xf32>
      %295 = arith.subf %287, %294 : vector<5x32xf32>
      %296 = arith.mulf %295, %295 : vector<5x32xf32>
      %cst_128 = arith.constant dense<0.000000e+00> : vector<5xf32>
      %297 = vector.multi_reduction <add>, %296, %cst_128 [1] : vector<5x32xf32> to vector<5xf32>
      %298 = vector.shape_cast %297 : vector<5xf32> to vector<5x1xf32>
      %cst_129 = arith.constant 3.200000e+01 : f32
      %299 = vector.broadcast %cst_129 : f32 to vector<5x1xf32>
      %300 = arith.divf %298, %299 : vector<5x1xf32>
      %301 = vector.broadcast %293 : vector<5x1xf32> to vector<5x32xf32>
      %302 = arith.subf %287, %301 : vector<5x32xf32>
      %cst_130 = arith.constant 9.99999974E-6 : f32
      %303 = vector.broadcast %cst_130 : f32 to vector<5x1xf32>
      %304 = arith.addf %300, %303 : vector<5x1xf32>
      %305 = math.rsqrt %304 : vector<5x1xf32>
      %306 = vector.broadcast %305 : vector<5x1xf32> to vector<5x32xf32>
      %307 = arith.mulf %302, %306 : vector<5x32xf32>
      %308 = vector.broadcast %288 : vector<1x32xf32> to vector<5x32xf32>
      %309 = arith.mulf %307, %308 : vector<5x32xf32>
      %310 = vector.broadcast %289 : vector<1x32xf32> to vector<5x32xf32>
      %311 = arith.addf %309, %310 : vector<5x32xf32>
      %c5 = arith.constant 5 : index
      %c0_131 = arith.constant 0 : index
      %312 = vector.load %arg23[%c5, %c0_131] : memref<10x32xf32, #tpu.memory_space<vmem>>, vector<5x32xf32>
      tpu.vector_store %arg23[%c5, %c0_131], %311 {strides = array<i32>} : memref<10x32xf32, #tpu.memory_space<vmem>>, vector<5x32xf32>,
    } else {
    }
    %c0 = arith.constant 0 : index
    %c0_1 = arith.constant 0 : index
    %3 = vector.load %arg23[%c0, %c0_1] : memref<10x32xf32, #tpu.memory_space<vmem>>, vector<10x32xf32>
    %c0_2 = arith.constant 0 : index
    %c0_3 = arith.constant 0 : index
    %c0_4 = arith.constant 0 : index
    %4 = vector.load %arg7[%c0_2, %c0_3, %c0_4] : memref<1x1x32xf32, #tpu.memory_space<vmem>>, vector<1x1x32xf32>
    %5 = vector.shape_cast %4 : vector<1x1x32xf32> to vector<1x32xf32>
    %c0_5 = arith.constant 0 : index
    %c0_6 = arith.constant 0 : index
    %c0_7 = arith.constant 0 : index
    %6 = vector.load %arg8[%c0_5, %c0_6, %c0_7] : memref<1x1x32xf32, #tpu.memory_space<vmem>>, vector<1x1x32xf32>
    %7 = vector.shape_cast %6 : vector<1x1x32xf32> to vector<1x32xf32>
    %c0_8 = arith.constant 0 : index
    %c0_9 = arith.constant 0 : index
    %c0_10 = arith.constant 0 : index
    %8 = vector.load %arg9[%c0_8, %c0_9, %c0_10] : memref<1x32x96xf32, #tpu.memory_space<vmem>>, vector<1x32x96xf32>
    %9 = vector.shape_cast %8 : vector<1x32x96xf32> to vector<32x96xf32>
    %c0_11 = arith.constant 0 : index
    %c0_12 = arith.constant 0 : index
    %c0_13 = arith.constant 0 : index
    %10 = vector.load %arg10[%c0_11, %c0_12, %c0_13] : memref<1x1x96xf32, #tpu.memory_space<vmem>>, vector<1x1x96xf32>
    %11 = vector.shape_cast %10 : vector<1x1x96xf32> to vector<1x96xf32>
    %c0_14 = arith.constant 0 : index
    %c0_15 = arith.constant 0 : index
    %c0_16 = arith.constant 0 : index
    %12 = vector.load %arg11[%c0_14, %c0_15, %c0_16] : memref<1x32x32xf32, #tpu.memory_space<vmem>>, vector<1x32x32xf32>
    %13 = vector.shape_cast %12 : vector<1x32x32xf32> to vector<32x32xf32>
    %c0_17 = arith.constant 0 : index
    %c0_18 = arith.constant 0 : index
    %c0_19 = arith.constant 0 : index
    %14 = vector.load %arg12[%c0_17, %c0_18, %c0_19] : memref<1x1x32xf32, #tpu.memory_space<vmem>>, vector<1x1x32xf32>
    %15 = vector.shape_cast %14 : vector<1x1x32xf32> to vector<1x32xf32>
    %c0_20 = arith.constant 0 : index
    %c0_21 = arith.constant 0 : index
    %c0_22 = arith.constant 0 : index
    %16 = vector.load %arg13[%c0_20, %c0_21, %c0_22] : memref<1x1x32xf32, #tpu.memory_space<vmem>>, vector<1x1x32xf32>
    %17 = vector.shape_cast %16 : vector<1x1x32xf32> to vector<1x32xf32>
    %c0_23 = arith.constant 0 : index
    %c0_24 = arith.constant 0 : index
    %c0_25 = arith.constant 0 : index
    %18 = vector.load %arg14[%c0_23, %c0_24, %c0_25] : memref<1x1x32xf32, #tpu.memory_space<vmem>>, vector<1x1x32xf32>
    %19 = vector.shape_cast %18 : vector<1x1x32xf32> to vector<1x32xf32>
    %c0_26 = arith.constant 0 : index
    %c0_27 = arith.constant 0 : index
    %c0_28 = arith.constant 0 : index
    %20 = vector.load %arg15[%c0_26, %c0_27, %c0_28] : memref<1x32x128xf32, #tpu.memory_space<vmem>>, vector<1x32x128xf32>
    %21 = vector.shape_cast %20 : vector<1x32x128xf32> to vector<32x128xf32>
    %c0_29 = arith.constant 0 : index
    %c0_30 = arith.constant 0 : index
    %c0_31 = arith.constant 0 : index
    %22 = vector.load %arg16[%c0_29, %c0_30, %c0_31] : memref<1x1x128xf32, #tpu.memory_space<vmem>>, vector<1x1x128xf32>
    %23 = vector.shape_cast %22 : vector<1x1x128xf32> to vector<1x128xf32>
    %c0_32 = arith.constant 0 : index
    %c0_33 = arith.constant 0 : index
    %c0_34 = arith.constant 0 : index
    %24 = vector.load %arg17[%c0_32, %c0_33, %c0_34] : memref<1x128x32xf32, #tpu.memory_space<vmem>>, vector<1x128x32xf32>
    %25 = vector.shape_cast %24 : vector<1x128x32xf32> to vector<128x32xf32>
    %c0_35 = arith.constant 0 : index
    %c0_36 = arith.constant 0 : index
    %c0_37 = arith.constant 0 : index
    %26 = vector.load %arg18[%c0_35, %c0_36, %c0_37] : memref<1x1x32xf32, #tpu.memory_space<vmem>>, vector<1x1x32xf32>
    %27 = vector.shape_cast %26 : vector<1x1x32xf32> to vector<1x32xf32>
    %cst = arith.constant dense<0.000000e+00> : vector<10xf32>
    %28 = vector.multi_reduction <add>, %3, %cst [1] : vector<10x32xf32> to vector<10xf32>
    %29 = vector.shape_cast %28 : vector<10xf32> to vector<10x1xf32>
    %cst_38 = arith.constant 3.200000e+01 : f32
    %30 = vector.broadcast %cst_38 : f32 to vector<10x1xf32>
    %31 = arith.divf %29, %30 : vector<10x1xf32>
    %32 = vector.broadcast %31 : vector<10x1xf32> to vector<10x32xf32>
    %33 = arith.subf %3, %32 : vector<10x32xf32>
    %34 = arith.mulf %33, %33 : vector<10x32xf32>
    %cst_39 = arith.constant dense<0.000000e+00> : vector<10xf32>
    %35 = vector.multi_reduction <add>, %34, %cst_39 [1] : vector<10x32xf32> to vector<10xf32>
    %36 = vector.shape_cast %35 : vector<10xf32> to vector<10x1xf32>
    %cst_40 = arith.constant 3.200000e+01 : f32
    %37 = vector.broadcast %cst_40 : f32 to vector<10x1xf32>
    %38 = arith.divf %36, %37 : vector<10x1xf32>
    %39 = vector.broadcast %31 : vector<10x1xf32> to vector<10x32xf32>
    %40 = arith.subf %3, %39 : vector<10x32xf32>
    %cst_41 = arith.constant 9.99999974E-6 : f32
    %41 = vector.broadcast %cst_41 : f32 to vector<10x1xf32>
    %42 = arith.addf %38, %41 : vector<10x1xf32>
    %43 = math.rsqrt %42 : vector<10x1xf32>
    %44 = vector.broadcast %43 : vector<10x1xf32> to vector<10x32xf32>
    %45 = arith.mulf %40, %44 : vector<10x32xf32>
    %46 = vector.broadcast %5 : vector<1x32xf32> to vector<10x32xf32>
    %47 = arith.mulf %45, %46 : vector<10x32xf32>
    %48 = vector.broadcast %7 : vector<1x32xf32> to vector<10x32xf32>
    %49 = arith.addf %47, %48 : vector<10x32xf32>
    %cst_42 = arith.constant dense<0.000000e+00> : vector<10x96xf32>
    %50 = tpu.matmul %49, %9, %cst_42 {dimension_numbers = #tpu.dot_dimension_numbers<[1], [0], [0], [1], [0, 0, 1, 1], [], []>} : vector<10x32xf32>, vector<32x96xf32>, vector<10x96xf32> -> vector<10x96xf32>
    %51 = vector.broadcast %11 : vector<1x96xf32> to vector<10x96xf32>
    %52 = arith.addf %50, %51 : vector<10x96xf32>
    %53 = vector.extract_strided_slice %52 {offsets = [0, 0], sizes = [5, 96], strides = [1, 1]} : vector<10x96xf32> to vector<5x96xf32>
    %54 = vector.extract_strided_slice %53 {offsets = [0, 0], sizes = [5, 32], strides = [1, 1]} : vector<5x96xf32> to vector<5x32xf32>
    %55 = vector.extract_strided_slice %53 {offsets = [0, 32], sizes = [5, 32], strides = [1, 1]} : vector<5x96xf32> to vector<5x32xf32>
    %56 = vector.extract_strided_slice %53 {offsets = [0, 64], sizes = [5, 32], strides = [1, 1]} : vector<5x96xf32> to vector<5x32xf32>
    %57 = vector.extract_strided_slice %54 {offsets = [0, 0], sizes = [5, 8], strides = [1, 1]} : vector<5x32xf32> to vector<5x8xf32>
    %58 = vector.extract_strided_slice %55 {offsets = [0, 0], sizes = [5, 8], strides = [1, 1]} : vector<5x32xf32> to vector<5x8xf32>
    %cst_43 = arith.constant dense<0.000000e+00> : vector<5x5xf32>
    %59 = tpu.matmul %57, %58, %cst_43 {dimension_numbers = #tpu.dot_dimension_numbers<[1], [1], [0], [0], [0, 0, 1, 0], [], []>} : vector<5x8xf32>, vector<5x8xf32>, vector<5x5xf32> -> vector<5x5xf32>
    %cst_44 = arith.constant 0.353553385 : f32
    %60 = vector.broadcast %cst_44 : f32 to vector<5x5xf32>
    %61 = arith.mulf %59, %60 : vector<5x5xf32>
    %cst_45 = arith.constant dense<0xFF800000> : vector<5xf32>
    %62 = vector.multi_reduction <maximumf>, %61, %cst_45 [1] : vector<5x5xf32> to vector<5xf32>
    %63 = vector.shape_cast %62 : vector<5xf32> to vector<5x1xf32>
    %64 = vector.broadcast %63 : vector<5x1xf32> to vector<5x5xf32>
    %65 = arith.subf %61, %64 : vector<5x5xf32>
    %66 = math.exp %65 : vector<5x5xf32>
    %cst_46 = arith.constant dense<0.000000e+00> : vector<5xf32>
    %67 = vector.multi_reduction <add>, %66, %cst_46 [1] : vector<5x5xf32> to vector<5xf32>
    %68 = vector.shape_cast %67 : vector<5xf32> to vector<5x1xf32>
    %69 = tpu.reciprocal %68 {approx = true} : vector<5x1xf32> -> vector<5x1xf32>
    %70 = vector.broadcast %69 : vector<5x1xf32> to vector<5x5xf32>
    %71 = arith.mulf %66, %70 : vector<5x5xf32>
    %72 = vector.extract_strided_slice %56 {offsets = [0, 0], sizes = [5, 8], strides = [1, 1]} : vector<5x32xf32> to vector<5x8xf32>
    %cst_47 = arith.constant dense<0.000000e+00> : vector<5x8xf32>
    %73 = tpu.matmul %71, %72, %cst_47 {dimension_numbers = #tpu.dot_dimension_numbers<[1], [0], [0], [1], [0, 0, 1, 1], [], []>} : vector<5x5xf32>, vector<5x8xf32>, vector<5x8xf32> -> vector<5x8xf32>
    %74 = vector.extract_strided_slice %54 {offsets = [0, 8], sizes = [5, 8], strides = [1, 1]} : vector<5x32xf32> to vector<5x8xf32>
    %75 = vector.extract_strided_slice %55 {offsets = [0, 8], sizes = [5, 8], strides = [1, 1]} : vector<5x32xf32> to vector<5x8xf32>
    %cst_48 = arith.constant dense<0.000000e+00> : vector<5x5xf32>
    %76 = tpu.matmul %74, %75, %cst_48 {dimension_numbers = #tpu.dot_dimension_numbers<[1], [1], [0], [0], [0, 0, 1, 0], [], []>} : vector<5x8xf32>, vector<5x8xf32>, vector<5x5xf32> -> vector<5x5xf32>
    %cst_49 = arith.constant 0.353553385 : f32
    %77 = vector.broadcast %cst_49 : f32 to vector<5x5xf32>
    %78 = arith.mulf %76, %77 : vector<5x5xf32>
    %cst_50 = arith.constant dense<0xFF800000> : vector<5xf32>
    %79 = vector.multi_reduction <maximumf>, %78, %cst_50 [1] : vector<5x5xf32> to vector<5xf32>
    %80 = vector.shape_cast %79 : vector<5xf32> to vector<5x1xf32>
    %81 = vector.broadcast %80 : vector<5x1xf32> to vector<5x5xf32>
    %82 = arith.subf %78, %81 : vector<5x5xf32>
    %83 = math.exp %82 : vector<5x5xf32>
    %cst_51 = arith.constant dense<0.000000e+00> : vector<5xf32>
    %84 = vector.multi_reduction <add>, %83, %cst_51 [1] : vector<5x5xf32> to vector<5xf32>
    %85 = vector.shape_cast %84 : vector<5xf32> to vector<5x1xf32>
    %86 = tpu.reciprocal %85 {approx = true} : vector<5x1xf32> -> vector<5x1xf32>
    %87 = vector.broadcast %86 : vector<5x1xf32> to vector<5x5xf32>
    %88 = arith.mulf %83, %87 : vector<5x5xf32>
    %89 = vector.extract_strided_slice %56 {offsets = [0, 8], sizes = [5, 8], strides = [1, 1]} : vector<5x32xf32> to vector<5x8xf32>
    %cst_52 = arith.constant dense<0.000000e+00> : vector<5x8xf32>
    %90 = tpu.matmul %88, %89, %cst_52 {dimension_numbers = #tpu.dot_dimension_numbers<[1], [0], [0], [1], [0, 0, 1, 1], [], []>} : vector<5x5xf32>, vector<5x8xf32>, vector<5x8xf32> -> vector<5x8xf32>
    %91 = vector.extract_strided_slice %54 {offsets = [0, 16], sizes = [5, 8], strides = [1, 1]} : vector<5x32xf32> to vector<5x8xf32>
    %92 = vector.extract_strided_slice %55 {offsets = [0, 16], sizes = [5, 8], strides = [1, 1]} : vector<5x32xf32> to vector<5x8xf32>
    %cst_53 = arith.constant dense<0.000000e+00> : vector<5x5xf32>
    %93 = tpu.matmul %91, %92, %cst_53 {dimension_numbers = #tpu.dot_dimension_numbers<[1], [1], [0], [0], [0, 0, 1, 0], [], []>} : vector<5x8xf32>, vector<5x8xf32>, vector<5x5xf32> -> vector<5x5xf32>
    %cst_54 = arith.constant 0.353553385 : f32
    %94 = vector.broadcast %cst_54 : f32 to vector<5x5xf32>
    %95 = arith.mulf %93, %94 : vector<5x5xf32>
    %cst_55 = arith.constant dense<0xFF800000> : vector<5xf32>
    %96 = vector.multi_reduction <maximumf>, %95, %cst_55 [1] : vector<5x5xf32> to vector<5xf32>
    %97 = vector.shape_cast %96 : vector<5xf32> to vector<5x1xf32>
    %98 = vector.broadcast %97 : vector<5x1xf32> to vector<5x5xf32>
    %99 = arith.subf %95, %98 : vector<5x5xf32>
    %100 = math.exp %99 : vector<5x5xf32>
    %cst_56 = arith.constant dense<0.000000e+00> : vector<5xf32>
    %101 = vector.multi_reduction <add>, %100, %cst_56 [1] : vector<5x5xf32> to vector<5xf32>
    %102 = vector.shape_cast %101 : vector<5xf32> to vector<5x1xf32>
    %103 = tpu.reciprocal %102 {approx = true} : vector<5x1xf32> -> vector<5x1xf32>
    %104 = vector.broadcast %103 : vector<5x1xf32> to vector<5x5xf32>
    %105 = arith.mulf %100, %104 : vector<5x5xf32>
    %106 = vector.extract_strided_slice %56 {offsets = [0, 16], sizes = [5, 8], strides = [1, 1]} : vector<5x32xf32> to vector<5x8xf32>
    %cst_57 = arith.constant dense<0.000000e+00> : vector<5x8xf32>
    %107 = tpu.matmul %105, %106, %cst_57 {dimension_numbers = #tpu.dot_dimension_numbers<[1], [0], [0], [1], [0, 0, 1, 1], [], []>} : vector<5x5xf32>, vector<5x8xf32>, vector<5x8xf32> -> vector<5x8xf32>
    %108 = vector.extract_strided_slice %54 {offsets = [0, 24], sizes = [5, 8], strides = [1, 1]} : vector<5x32xf32> to vector<5x8xf32>
    %109 = vector.extract_strided_slice %55 {offsets = [0, 24], sizes = [5, 8], strides = [1, 1]} : vector<5x32xf32> to vector<5x8xf32>
    %cst_58 = arith.constant dense<0.000000e+00> : vector<5x5xf32>
    %110 = tpu.matmul %108, %109, %cst_58 {dimension_numbers = #tpu.dot_dimension_numbers<[1], [1], [0], [0], [0, 0, 1, 0], [], []>} : vector<5x8xf32>, vector<5x8xf32>, vector<5x5xf32> -> vector<5x5xf32>
    %cst_59 = arith.constant 0.353553385 : f32
    %111 = vector.broadcast %cst_59 : f32 to vector<5x5xf32>
    %112 = arith.mulf %110, %111 : vector<5x5xf32>
    %cst_60 = arith.constant dense<0xFF800000> : vector<5xf32>
    %113 = vector.multi_reduction <maximumf>, %112, %cst_60 [1] : vector<5x5xf32> to vector<5xf32>
    %114 = vector.shape_cast %113 : vector<5xf32> to vector<5x1xf32>
    %115 = vector.broadcast %114 : vector<5x1xf32> to vector<5x5xf32>
    %116 = arith.subf %112, %115 : vector<5x5xf32>
    %117 = math.exp %116 : vector<5x5xf32>
    %cst_61 = arith.constant dense<0.000000e+00> : vector<5xf32>
    %118 = vector.multi_reduction <add>, %117, %cst_61 [1] : vector<5x5xf32> to vector<5xf32>
    %119 = vector.shape_cast %118 : vector<5xf32> to vector<5x1xf32>
    %120 = tpu.reciprocal %119 {approx = true} : vector<5x1xf32> -> vector<5x1xf32>
    %121 = vector.broadcast %120 : vector<5x1xf32> to vector<5x5xf32>
    %122 = arith.mulf %117, %121 : vector<5x5xf32>
    %123 = vector.extract_strided_slice %56 {offsets = [0, 24], sizes = [5, 8], strides = [1, 1]} : vector<5x32xf32> to vector<5x8xf32>
    %cst_62 = arith.constant dense<0.000000e+00> : vector<5x8xf32>
    %124 = tpu.matmul %122, %123, %cst_62 {dimension_numbers = #tpu.dot_dimension_numbers<[1], [0], [0], [1], [0, 0, 1, 1], [], []>} : vector<5x5xf32>, vector<5x8xf32>, vector<5x8xf32> -> vector<5x8xf32>
    %125 = tpu.concatenate %73, %90, %107, %124 in 1 : vector<5x8xf32>, vector<5x8xf32>, vector<5x8xf32>, vector<5x8xf32> -> vector<5x32xf32>
    %126 = vector.extract_strided_slice %52 {offsets = [5, 0], sizes = [5, 96], strides = [1, 1]} : vector<10x96xf32> to vector<5x96xf32>
    %127 = vector.extract_strided_slice %126 {offsets = [0, 0], sizes = [5, 32], strides = [1, 1]} : vector<5x96xf32> to vector<5x32xf32>
    %128 = vector.extract_strided_slice %126 {offsets = [0, 32], sizes = [5, 32], strides = [1, 1]} : vector<5x96xf32> to vector<5x32xf32>
    %129 = vector.extract_strided_slice %126 {offsets = [0, 64], sizes = [5, 32], strides = [1, 1]} : vector<5x96xf32> to vector<5x32xf32>
    %130 = vector.extract_strided_slice %127 {offsets = [0, 0], sizes = [5, 8], strides = [1, 1]} : vector<5x32xf32> to vector<5x8xf32>
    %131 = vector.extract_strided_slice %128 {offsets = [0, 0], sizes = [5, 8], strides = [1, 1]} : vector<5x32xf32> to vector<5x8xf32>
    %cst_63 = arith.constant dense<0.000000e+00> : vector<5x5xf32>
    %132 = tpu.matmul %130, %131, %cst_63 {dimension_numbers = #tpu.dot_dimension_numbers<[1], [1], [0], [0], [0, 0, 1, 0], [], []>} : vector<5x8xf32>, vector<5x8xf32>, vector<5x5xf32> -> vector<5x5xf32>
    %cst_64 = arith.constant 0.353553385 : f32
    %133 = vector.broadcast %cst_64 : f32 to vector<5x5xf32>
    %134 = arith.mulf %132, %133 : vector<5x5xf32>
    %cst_65 = arith.constant dense<0xFF800000> : vector<5xf32>
    %135 = vector.multi_reduction <maximumf>, %134, %cst_65 [1] : vector<5x5xf32> to vector<5xf32>
    %136 = vector.shape_cast %135 : vector<5xf32> to vector<5x1xf32>
    %137 = vector.broadcast %136 : vector<5x1xf32> to vector<5x5xf32>
    %138 = arith.subf %134, %137 : vector<5x5xf32>
    %139 = math.exp %138 : vector<5x5xf32>
    %cst_66 = arith.constant dense<0.000000e+00> : vector<5xf32>
    %140 = vector.multi_reduction <add>, %139, %cst_66 [1] : vector<5x5xf32> to vector<5xf32>
    %141 = vector.shape_cast %140 : vector<5xf32> to vector<5x1xf32>
    %142 = tpu.reciprocal %141 {approx = true} : vector<5x1xf32> -> vector<5x1xf32>
    %143 = vector.broadcast %142 : vector<5x1xf32> to vector<5x5xf32>
    %144 = arith.mulf %139, %143 : vector<5x5xf32>
    %145 = vector.extract_strided_slice %129 {offsets = [0, 0], sizes = [5, 8], strides = [1, 1]} : vector<5x32xf32> to vector<5x8xf32>
    %cst_67 = arith.constant dense<0.000000e+00> : vector<5x8xf32>
    %146 = tpu.matmul %144, %145, %cst_67 {dimension_numbers = #tpu.dot_dimension_numbers<[1], [0], [0], [1], [0, 0, 1, 1], [], []>} : vector<5x5xf32>, vector<5x8xf32>, vector<5x8xf32> -> vector<5x8xf32>
    %147 = vector.extract_strided_slice %127 {offsets = [0, 8], sizes = [5, 8], strides = [1, 1]} : vector<5x32xf32> to vector<5x8xf32>
    %148 = vector.extract_strided_slice %128 {offsets = [0, 8], sizes = [5, 8], strides = [1, 1]} : vector<5x32xf32> to vector<5x8xf32>
    %cst_68 = arith.constant dense<0.000000e+00> : vector<5x5xf32>
    %149 = tpu.matmul %147, %148, %cst_68 {dimension_numbers = #tpu.dot_dimension_numbers<[1], [1], [0], [0], [0, 0, 1, 0], [], []>} : vector<5x8xf32>, vector<5x8xf32>, vector<5x5xf32> -> vector<5x5xf32>
    %cst_69 = arith.constant 0.353553385 : f32
    %150 = vector.broadcast %cst_69 : f32 to vector<5x5xf32>
    %151 = arith.mulf %149, %150 : vector<5x5xf32>
    %cst_70 = arith.constant dense<0xFF800000> : vector<5xf32>
    %152 = vector.multi_reduction <maximumf>, %151, %cst_70 [1] : vector<5x5xf32> to vector<5xf32>
    %153 = vector.shape_cast %152 : vector<5xf32> to vector<5x1xf32>
    %154 = vector.broadcast %153 : vector<5x1xf32> to vector<5x5xf32>
    %155 = arith.subf %151, %154 : vector<5x5xf32>
    %156 = math.exp %155 : vector<5x5xf32>
    %cst_71 = arith.constant dense<0.000000e+00> : vector<5xf32>
    %157 = vector.multi_reduction <add>, %156, %cst_71 [1] : vector<5x5xf32> to vector<5xf32>
    %158 = vector.shape_cast %157 : vector<5xf32> to vector<5x1xf32>
    %159 = tpu.reciprocal %158 {approx = true} : vector<5x1xf32> -> vector<5x1xf32>
    %160 = vector.broadcast %159 : vector<5x1xf32> to vector<5x5xf32>
    %161 = arith.mulf %156, %160 : vector<5x5xf32>
    %162 = vector.extract_strided_slice %129 {offsets = [0, 8], sizes = [5, 8], strides = [1, 1]} : vector<5x32xf32> to vector<5x8xf32>
    %cst_72 = arith.constant dense<0.000000e+00> : vector<5x8xf32>
    %163 = tpu.matmul %161, %162, %cst_72 {dimension_numbers = #tpu.dot_dimension_numbers<[1], [0], [0], [1], [0, 0, 1, 1], [], []>} : vector<5x5xf32>, vector<5x8xf32>, vector<5x8xf32> -> vector<5x8xf32>
    %164 = vector.extract_strided_slice %127 {offsets = [0, 16], sizes = [5, 8], strides = [1, 1]} : vector<5x32xf32> to vector<5x8xf32>
    %165 = vector.extract_strided_slice %128 {offsets = [0, 16], sizes = [5, 8], strides = [1, 1]} : vector<5x32xf32> to vector<5x8xf32>
    %cst_73 = arith.constant dense<0.000000e+00> : vector<5x5xf32>
    %166 = tpu.matmul %164, %165, %cst_73 {dimension_numbers = #tpu.dot_dimension_numbers<[1], [1], [0], [0], [0, 0, 1, 0], [], []>} : vector<5x8xf32>, vector<5x8xf32>, vector<5x5xf32> -> vector<5x5xf32>
    %cst_74 = arith.constant 0.353553385 : f32
    %167 = vector.broadcast %cst_74 : f32 to vector<5x5xf32>
    %168 = arith.mulf %166, %167 : vector<5x5xf32>
    %cst_75 = arith.constant dense<0xFF800000> : vector<5xf32>
    %169 = vector.multi_reduction <maximumf>, %168, %cst_75 [1] : vector<5x5xf32> to vector<5xf32>
    %170 = vector.shape_cast %169 : vector<5xf32> to vector<5x1xf32>
    %171 = vector.broadcast %170 : vector<5x1xf32> to vector<5x5xf32>
    %172 = arith.subf %168, %171 : vector<5x5xf32>
    %173 = math.exp %172 : vector<5x5xf32>
    %cst_76 = arith.constant dense<0.000000e+00> : vector<5xf32>
    %174 = vector.multi_reduction <add>, %173, %cst_76 [1] : vector<5x5xf32> to vector<5xf32>
    %175 = vector.shape_cast %174 : vector<5xf32> to vector<5x1xf32>
    %176 = tpu.reciprocal %175 {approx = true} : vector<5x1xf32> -> vector<5x1xf32>
    %177 = vector.broadcast %176 : vector<5x1xf32> to vector<5x5xf32>
    %178 = arith.mulf %173, %177 : vector<5x5xf32>
    %179 = vector.extract_strided_slice %129 {offsets = [0, 16], sizes = [5, 8], strides = [1, 1]} : vector<5x32xf32> to vector<5x8xf32>
    %cst_77 = arith.constant dense<0.000000e+00> : vector<5x8xf32>
    %180 = tpu.matmul %178, %179, %cst_77 {dimension_numbers = #tpu.dot_dimension_numbers<[1], [0], [0], [1], [0, 0, 1, 1], [], []>} : vector<5x5xf32>, vector<5x8xf32>, vector<5x8xf32> -> vector<5x8xf32>
    %181 = vector.extract_strided_slice %127 {offsets = [0, 24], sizes = [5, 8], strides = [1, 1]} : vector<5x32xf32> to vector<5x8xf32>
    %182 = vector.extract_strided_slice %128 {offsets = [0, 24], sizes = [5, 8], strides = [1, 1]} : vector<5x32xf32> to vector<5x8xf32>
    %cst_78 = arith.constant dense<0.000000e+00> : vector<5x5xf32>
    %183 = tpu.matmul %181, %182, %cst_78 {dimension_numbers = #tpu.dot_dimension_numbers<[1], [1], [0], [0], [0, 0, 1, 0], [], []>} : vector<5x8xf32>, vector<5x8xf32>, vector<5x5xf32> -> vector<5x5xf32>
    %cst_79 = arith.constant 0.353553385 : f32
    %184 = vector.broadcast %cst_79 : f32 to vector<5x5xf32>
    %185 = arith.mulf %183, %184 : vector<5x5xf32>
    %cst_80 = arith.constant dense<0xFF800000> : vector<5xf32>
    %186 = vector.multi_reduction <maximumf>, %185, %cst_80 [1] : vector<5x5xf32> to vector<5xf32>
    %187 = vector.shape_cast %186 : vector<5xf32> to vector<5x1xf32>
    %188 = vector.broadcast %187 : vector<5x1xf32> to vector<5x5xf32>
    %189 = arith.subf %185, %188 : vector<5x5xf32>
    %190 = math.exp %189 : vector<5x5xf32>
    %cst_81 = arith.constant dense<0.000000e+00> : vector<5xf32>
    %191 = vector.multi_reduction <add>, %190, %cst_81 [1] : vector<5x5xf32> to vector<5xf32>
    %192 = vector.shape_cast %191 : vector<5xf32> to vector<5x1xf32>
    %193 = tpu.reciprocal %192 {approx = true} : vector<5x1xf32> -> vector<5x1xf32>
    %194 = vector.broadcast %193 : vector<5x1xf32> to vector<5x5xf32>
    %195 = arith.mulf %190, %194 : vector<5x5xf32>
    %196 = vector.extract_strided_slice %129 {offsets = [0, 24], sizes = [5, 8], strides = [1, 1]} : vector<5x32xf32> to vector<5x8xf32>
    %cst_82 = arith.constant dense<0.000000e+00> : vector<5x8xf32>
    %197 = tpu.matmul %195, %196, %cst_82 {dimension_numbers = #tpu.dot_dimension_numbers<[1], [0], [0], [1], [0, 0, 1, 1], [], []>} : vector<5x5xf32>, vector<5x8xf32>, vector<5x8xf32> -> vector<5x8xf32>
    %198 = tpu.concatenate %146, %163, %180, %197 in 1 : vector<5x8xf32>, vector<5x8xf32>, vector<5x8xf32>, vector<5x8xf32> -> vector<5x32xf32>
    %199 = tpu.concatenate %125, %198 in 0 : vector<5x32xf32>, vector<5x32xf32> -> vector<10x32xf32>
    %cst_83 = arith.constant dense<0.000000e+00> : vector<10x32xf32>
    %200 = tpu.matmul %199, %13, %cst_83 {dimension_numbers = #tpu.dot_dimension_numbers<[1], [0], [0], [1], [0, 0, 1, 1], [], []>} : vector<10x32xf32>, vector<32x32xf32>, vector<10x32xf32> -> vector<10x32xf32>
    %201 = arith.addf %3, %200 : vector<10x32xf32>
    %202 = vector.broadcast %15 : vector<1x32xf32> to vector<10x32xf32>
    %203 = arith.addf %201, %202 : vector<10x32xf32>
    %cst_84 = arith.constant dense<0.000000e+00> : vector<10xf32>
    %204 = vector.multi_reduction <add>, %203, %cst_84 [1] : vector<10x32xf32> to vector<10xf32>
    %205 = vector.shape_cast %204 : vector<10xf32> to vector<10x1xf32>
    %cst_85 = arith.constant 3.200000e+01 : f32
    %206 = vector.broadcast %cst_85 : f32 to vector<10x1xf32>
    %207 = arith.divf %205, %206 : vector<10x1xf32>
    %208 = vector.broadcast %207 : vector<10x1xf32> to vector<10x32xf32>
    %209 = arith.subf %203, %208 : vector<10x32xf32>
    %210 = arith.mulf %209, %209 : vector<10x32xf32>
    %cst_86 = arith.constant dense<0.000000e+00> : vector<10xf32>
    %211 = vector.multi_reduction <add>, %210, %cst_86 [1] : vector<10x32xf32> to vector<10xf32>
    %212 = vector.shape_cast %211 : vector<10xf32> to vector<10x1xf32>
    %cst_87 = arith.constant 3.200000e+01 : f32
    %213 = vector.broadcast %cst_87 : f32 to vector<10x1xf32>
    %214 = arith.divf %212, %213 : vector<10x1xf32>
    %215 = vector.broadcast %207 : vector<10x1xf32> to vector<10x32xf32>
    %216 = arith.subf %203, %215 : vector<10x32xf32>
    %cst_88 = arith.constant 9.99999974E-6 : f32
    %217 = vector.broadcast %cst_88 : f32 to vector<10x1xf32>
    %218 = arith.addf %214, %217 : vector<10x1xf32>
    %219 = math.rsqrt %218 : vector<10x1xf32>
    %220 = vector.broadcast %219 : vector<10x1xf32> to vector<10x32xf32>
    %221 = arith.mulf %216, %220 : vector<10x32xf32>
    %222 = vector.broadcast %17 : vector<1x32xf32> to vector<10x32xf32>
    %223 = arith.mulf %221, %222 : vector<10x32xf32>
    %224 = vector.broadcast %19 : vector<1x32xf32> to vector<10x32xf32>
    %225 = arith.addf %223, %224 : vector<10x32xf32>
    %cst_89 = arith.constant dense<0.000000e+00> : vector<10x128xf32>
    %226 = tpu.matmul %225, %21, %cst_89 {dimension_numbers = #tpu.dot_dimension_numbers<[1], [0], [0], [1], [0, 0, 1, 1], [], []>} : vector<10x32xf32>, vector<32x128xf32>, vector<10x128xf32> -> vector<10x128xf32>
    %227 = vector.broadcast %23 : vector<1x128xf32> to vector<10x128xf32>
    %228 = arith.addf %226, %227 : vector<10x128xf32>
    %cst_90 = arith.constant 5.000000e-01 : f32
    %229 = vector.broadcast %cst_90 : f32 to vector<10x128xf32>
    %230 = arith.mulf %229, %228 : vector<10x128xf32>
    %cst_91 = arith.constant 4.471500e-02 : f32
    %231 = vector.broadcast %cst_91 : f32 to vector<10x128xf32>
    %232 = arith.mulf %231, %228 : vector<10x128xf32>
    %233 = arith.mulf %232, %228 : vector<10x128xf32>
    %234 = arith.mulf %233, %228 : vector<10x128xf32>
    %235 = arith.addf %228, %234 : vector<10x128xf32>
    %cst_92 = arith.constant 0.797884583 : f32
    %236 = vector.broadcast %cst_92 : f32 to vector<10x128xf32>
    %237 = arith.mulf %236, %235 : vector<10x128xf32>
    %238 = math.tanh %237 : vector<10x128xf32>
    %cst_93 = arith.constant 1.000000e+00 : f32
    %239 = vector.broadcast %cst_93 : f32 to vector<10x128xf32>
    %240 = arith.addf %239, %238 : vector<10x128xf32>
    %241 = arith.mulf %230, %240 : vector<10x128xf32>
    %cst_94 = arith.constant dense<0.000000e+00> : vector<10x32xf32>
    %242 = tpu.matmul %241, %25, %cst_94 {dimension_numbers = #tpu.dot_dimension_numbers<[1], [0], [0], [1], [0, 0, 1, 1], [], []>} : vector<10x128xf32>, vector<128x32xf32>, vector<10x32xf32> -> vector<10x32xf32>
    %243 = arith.addf %203, %242 : vector<10x32xf32>
    %244 = vector.broadcast %27 : vector<1x32xf32> to vector<10x32xf32>
    %245 = arith.addf %243, %244 : vector<10x32xf32>
    %c0_95 = arith.constant 0 : index
    %c0_96 = arith.constant 0 : index
    %246 = vector.load %arg23[%c0_95, %c0_96] : memref<10x32xf32, #tpu.memory_space<vmem>>, vector<10x32xf32>
    tpu.vector_store %arg23[%c0_95, %c0_96], %245 {strides = array<i32>} : memref<10x32xf32, #tpu.memory_space<vmem>>, vector<10x32xf32>,
    %c1_i32 = arith.constant 1 : i32
    %247 = arith.cmpi eq, %arg0, %c1_i32 : i32
    %248 = arith.extui %247 : i1 to i32
    %c0_i32_97 = arith.constant 0 : i32
    %249 = arith.cmpi ne, %248, %c0_i32_97 : i32
    scf.if %249 {
      %250 = vector.extract_strided_slice %245 {offsets = [0, 0], sizes = [1, 32], strides = [1, 1]} : vector<10x32xf32> to vector<1x32xf32>
      %251 = vector.extract_strided_slice %245 {offsets = [5, 0], sizes = [1, 32], strides = [1, 1]} : vector<10x32xf32> to vector<1x32xf32>
      %252 = tpu.concatenate %250, %251 in 0 : vector<1x32xf32>, vector<1x32xf32> -> vector<2x32xf32>
      %c0_98 = arith.constant 0 : index
      %c0_99 = arith.constant 0 : index
      %253 = vector.load %arg19[%c0_98, %c0_99] : memref<1x32xf32, #tpu.memory_space<vmem>>, vector<1x32xf32>
      %c0_100 = arith.constant 0 : index
      %c0_101 = arith.constant 0 : index
      %254 = vector.load %arg20[%c0_100, %c0_101] : memref<1x32xf32, #tpu.memory_space<vmem>>, vector<1x32xf32>
      %cst_102 = arith.constant dense<0.000000e+00> : vector<2xf32>
      %255 = vector.multi_reduction <add>, %252, %cst_102 [1] : vector<2x32xf32> to vector<2xf32>
      %256 = vector.shape_cast %255 : vector<2xf32> to vector<2x1xf32>
      %cst_103 = arith.constant 3.200000e+01 : f32
      %257 = vector.broadcast %cst_103 : f32 to vector<2x1xf32>
      %258 = arith.divf %256, %257 : vector<2x1xf32>
      %259 = vector.broadcast %258 : vector<2x1xf32> to vector<2x32xf32>
      %260 = arith.subf %252, %259 : vector<2x32xf32>
      %261 = arith.mulf %260, %260 : vector<2x32xf32>
      %cst_104 = arith.constant dense<0.000000e+00> : vector<2xf32>
      %262 = vector.multi_reduction <add>, %261, %cst_104 [1] : vector<2x32xf32> to vector<2xf32>
      %263 = vector.shape_cast %262 : vector<2xf32> to vector<2x1xf32>
      %cst_105 = arith.constant 3.200000e+01 : f32
      %264 = vector.broadcast %cst_105 : f32 to vector<2x1xf32>
      %265 = arith.divf %263, %264 : vector<2x1xf32>
      %266 = vector.broadcast %258 : vector<2x1xf32> to vector<2x32xf32>
      %267 = arith.subf %252, %266 : vector<2x32xf32>
      %cst_106 = arith.constant 9.99999974E-6 : f32
      %268 = vector.broadcast %cst_106 : f32 to vector<2x1xf32>
      %269 = arith.addf %265, %268 : vector<2x1xf32>
      %270 = math.rsqrt %269 : vector<2x1xf32>
      %271 = vector.broadcast %270 : vector<2x1xf32> to vector<2x32xf32>
      %272 = arith.mulf %267, %271 : vector<2x32xf32>
      %273 = vector.broadcast %253 : vector<1x32xf32> to vector<2x32xf32>
      %274 = arith.mulf %272, %273 : vector<2x32xf32>
      %275 = vector.broadcast %254 : vector<1x32xf32> to vector<2x32xf32>
      %276 = arith.addf %274, %275 : vector<2x32xf32>
      %c0_107 = arith.constant 0 : index
      %c0_108 = arith.constant 0 : index
      %277 = vector.load %arg21[%c0_107, %c0_108] : memref<32x32xf32, #tpu.memory_space<vmem>>, vector<32x32xf32>
      %cst_109 = arith.constant dense<0.000000e+00> : vector<2x32xf32>
      %278 = tpu.matmul %276, %277, %cst_109 {dimension_numbers = #tpu.dot_dimension_numbers<[1], [0], [0], [1], [0, 0, 1, 1], [], []>} : vector<2x32xf32>, vector<32x32xf32>, vector<2x32xf32> -> vector<2x32xf32>
      %279 = arith.mulf %278, %278 : vector<2x32xf32>
      %cst_110 = arith.constant dense<0.000000e+00> : vector<2xf32>
      %280 = vector.multi_reduction <add>, %279, %cst_110 [1] : vector<2x32xf32> to vector<2xf32>
      %281 = vector.shape_cast %280 : vector<2xf32> to vector<2x1xf32>
      %282 = math.sqrt %281 : vector<2x1xf32>
      %cst_111 = arith.constant 9.99999996E-13 : f32
      %283 = vector.broadcast %cst_111 : f32 to vector<2x1xf32>
      %284 = arith.maximumf %282, %283 : vector<2x1xf32>
      %285 = vector.broadcast %284 : vector<2x1xf32> to vector<2x32xf32>
      %286 = arith.divf %278, %285 : vector<2x32xf32>
      %c0_112 = arith.constant 0 : index
      %c0_113 = arith.constant 0 : index
      %287 = vector.load %arg22[%c0_112, %c0_113] : memref<2x32xf32, #tpu.memory_space<vmem>>, vector<2x32xf32>
      tpu.vector_store %arg22[%c0_112, %c0_113], %286 {strides = array<i32>} : memref<2x32xf32, #tpu.memory_space<vmem>>, vector<2x32xf32>,
    } else {
    }
    return
  }
  func.func @transform_0(%arg0: i32) -> (i32, i32) {
    %c0_i32 = arith.constant 0 : i32
    %c0_i32_0 = arith.constant 0 : i32
    %c0_i32_1 = arith.constant 0 : i32
    return %c0_i32, %c0_i32_0 : i32, i32
  }
  func.func @transform_1(%arg0: i32) -> (i32, i32) {
    %c0_i32 = arith.constant 0 : i32
    %c0_i32_0 = arith.constant 0 : i32
    %c0_i32_1 = arith.constant 0 : i32
    return %c0_i32, %c0_i32_0 : i32, i32
  }
  func.func @transform_2(%arg0: i32) -> (i32, i32) {
    %c0_i32 = arith.constant 0 : i32
    %c0_i32_0 = arith.constant 0 : i32
    %c0_i32_1 = arith.constant 0 : i32
    return %c0_i32, %c0_i32_0 : i32, i32
  }
  func.func @transform_3(%arg0: i32) -> (i32, i32) {
    %c0_i32 = arith.constant 0 : i32
    %c0_i32_0 = arith.constant 0 : i32
    %c0_i32_1 = arith.constant 0 : i32
    return %c0_i32, %c0_i32_0 : i32, i32
  }
  func.func @transform_4(%arg0: i32) -> (i32, i32) {
    %c0_i32 = arith.constant 0 : i32
    %c0_i32_0 = arith.constant 0 : i32
    %c0_i32_1 = arith.constant 0 : i32
    return %c0_i32, %c0_i32_0 : i32, i32
  }
  func.func @transform_5(%arg0: i32) -> (i32, i32) {
    %c0_i32 = arith.constant 0 : i32
    %c0_i32_0 = arith.constant 0 : i32
    %c0_i32_1 = arith.constant 0 : i32
    return %c0_i32, %c0_i32_0 : i32, i32
  }
  func.func @transform_6(%arg0: i32) -> (i32, i32, i32) {
    %c0_i32 = arith.constant 0 : i32
    %c0_i32_0 = arith.constant 0 : i32
    %c0_i32_1 = arith.constant 0 : i32
    return %arg0, %c0_i32, %c0_i32_0 : i32, i32, i32
  }
  func.func @transform_7(%arg0: i32) -> (i32, i32, i32) {
    %c0_i32 = arith.constant 0 : i32
    %c0_i32_0 = arith.constant 0 : i32
    %c0_i32_1 = arith.constant 0 : i32
    return %arg0, %c0_i32, %c0_i32_0 : i32, i32, i32
  }
  func.func @transform_8(%arg0: i32) -> (i32, i32, i32) {
    %c0_i32 = arith.constant 0 : i32
    %c0_i32_0 = arith.constant 0 : i32
    %c0_i32_1 = arith.constant 0 : i32
    return %arg0, %c0_i32, %c0_i32_0 : i32, i32, i32
  }
  func.func @transform_9(%arg0: i32) -> (i32, i32, i32) {
    %c0_i32 = arith.constant 0 : i32
    %c0_i32_0 = arith.constant 0 : i32
    %c0_i32_1 = arith.constant 0 : i32
    return %arg0, %c0_i32, %c0_i32_0 : i32, i32, i32
  }
  func.func @transform_10(%arg0: i32) -> (i32, i32, i32) {
    %c0_i32 = arith.constant 0 : i32
    %c0_i32_0 = arith.constant 0 : i32
    %c0_i32_1 = arith.constant 0 : i32
    return %arg0, %c0_i32, %c0_i32_0 : i32, i32, i32
  }
  func.func @transform_11(%arg0: i32) -> (i32, i32, i32) {
    %c0_i32 = arith.constant 0 : i32
    %c0_i32_0 = arith.constant 0 : i32
    %c0_i32_1 = arith.constant 0 : i32
    return %arg0, %c0_i32, %c0_i32_0 : i32, i32, i32
  }
  func.func @transform_12(%arg0: i32) -> (i32, i32, i32) {
    %c0_i32 = arith.constant 0 : i32
    %c0_i32_0 = arith.constant 0 : i32
    %c0_i32_1 = arith.constant 0 : i32
    return %arg0, %c0_i32, %c0_i32_0 : i32, i32, i32
  }
  func.func @transform_13(%arg0: i32) -> (i32, i32, i32) {
    %c0_i32 = arith.constant 0 : i32
    %c0_i32_0 = arith.constant 0 : i32
    %c0_i32_1 = arith.constant 0 : i32
    return %arg0, %c0_i32, %c0_i32_0 : i32, i32, i32
  }
  func.func @transform_14(%arg0: i32) -> (i32, i32, i32) {
    %c0_i32 = arith.constant 0 : i32
    %c0_i32_0 = arith.constant 0 : i32
    %c0_i32_1 = arith.constant 0 : i32
    return %arg0, %c0_i32, %c0_i32_0 : i32, i32, i32
  }
  func.func @transform_15(%arg0: i32) -> (i32, i32, i32) {
    %c0_i32 = arith.constant 0 : i32
    %c0_i32_0 = arith.constant 0 : i32
    %c0_i32_1 = arith.constant 0 : i32
    return %arg0, %c0_i32, %c0_i32_0 : i32, i32, i32
  }
  func.func @transform_16(%arg0: i32) -> (i32, i32, i32) {
    %c0_i32 = arith.constant 0 : i32
    %c0_i32_0 = arith.constant 0 : i32
    %c0_i32_1 = arith.constant 0 : i32
    return %arg0, %c0_i32, %c0_i32_0 : i32, i32, i32
  }
  func.func @transform_17(%arg0: i32) -> (i32, i32, i32) {
    %c0_i32 = arith.constant 0 : i32
    %c0_i32_0 = arith.constant 0 : i32
    %c0_i32_1 = arith.constant 0 : i32
    return %arg0, %c0_i32, %c0_i32_0 : i32, i32, i32
  }
  func.func @transform_18(%arg0: i32) -> (i32, i32) {
    %c0_i32 = arith.constant 0 : i32
    %c0_i32_0 = arith.constant 0 : i32
    %c0_i32_1 = arith.constant 0 : i32
    return %c0_i32, %c0_i32_0 : i32, i32
  }
  func.func @transform_19(%arg0: i32) -> (i32, i32) {
    %c0_i32 = arith.constant 0 : i32
    %c0_i32_0 = arith.constant 0 : i32
    %c0_i32_1 = arith.constant 0 : i32
    return %c0_i32, %c0_i32_0 : i32, i32
  }
  func.func @transform_20(%arg0: i32) -> (i32, i32) {
    %c0_i32 = arith.constant 0 : i32
    %c0_i32_0 = arith.constant 0 : i32
    %c0_i32_1 = arith.constant 0 : i32
    return %c0_i32, %c0_i32_0 : i32, i32
  }
  func.func @transform_21(%arg0: i32) -> (i32, i32) {
    %c0_i32 = arith.constant 0 : i32
    %c0_i32_0 = arith.constant 0 : i32
    %c0_i32_1 = arith.constant 0 : i32
    return %c0_i32, %c0_i32_0 : i32, i32
  }
}

</mosaic_0001>

<bundles_post_ra>
// kernel: tpu_custom_call.1
= control target key start
LH: loop header
LB: loop body
LE: loop exit
PB: predicated region body
PF: predicated region fallthrough
CT: control target
= control target key end

     0   :  { %s4207_s0 = inlined_call_operand.vmem [shape: f32[8,192], index: 0, kind: input, shape index: {}]   ;;  %s4208_s1 = inlined_call_operand.vmem [shape: f32[192,32], index: 1, kind: input, shape index: {}]   ;;  %s4209_s2 = inlined_call_operand.vmem [shape: f32[1,32], index: 2, kind: input, shape index: {}]   ;;  %s4210_s3 = inlined_call_operand.vmem [shape: f32[5,32], index: 3, kind: input, shape index: {}]   ;;  %s4211_s4 = inlined_call_operand.vmem [shape: f32[1,32], index: 4, kind: input, shape index: {}]   ;;  %s4212_s5 = inlined_call_operand.vmem [shape: f32[1,32], index: 5, kind: input, shape index: {}]   ;;  %s4213_s6 = inlined_call_operand.vmem [shape: f32[2,1,32], index: 6, kind: input, shape index: {}]   ;;  %s4214_s7 = inlined_call_operand.vmem [shape: f32[2,1,32], index: 7, kind: input, shape index: {}]   ;;  %s4215_s8 = inlined_call_operand.vmem [shape: f32[2,32,96], index: 8, kind: input, shape index: {}]   ;;  %s4216_s9 = inlined_call_operand.vmem [shape: f32[2,1,96], index: 9, kind: input, shape index: {}]   ;;  %s4217_s10 = inlined_call_operand.vmem [shape: f32[2,32,32], index: 10, kind: input, shape index: {}]   ;;  %s4218_s11 = inlined_call_operand.vmem [shape: f32[2,1,32], index: 11, kind: input, shape index: {}]   ;;  %s4219_s12 = inlined_call_operand.vmem [shape: f32[2,1,32], index: 12, kind: input, shape index: {}]   ;;  %s4220_s13 = inlined_call_operand.vmem [shape: f32[2,1,32], index: 13, kind: input, shape index: {}]   ;;  %s4221_s14 = inlined_call_operand.vmem [shape: f32[2,32,128], index: 14, kind: input, shape index: {}]   ;;  %s4222_s15 = inlined_call_operand.vmem [shape: f32[2,1,128], index: 15, kind: input, shape index: {}]   ;;  %s4223_s16 = inlined_call_operand.vmem [shape: f32[2,128,32], index: 16, kind: input, shape index: {}]   ;;  %s4224_s17 = inlined_call_operand.vmem [shape: f32[2,1,32], index: 17, kind: input, shape index: {}]   ;;  %s4225_s18 = inlined_call_operand.vmem [shape: f32[1,32], index: 18, kind: input, shape index: {}]   ;;  %s4226_s19 = inlined_call_operand.vmem [shape: f32[1,32], index: 19, kind: input, shape index: {}]   ;;  %s4227_s20 = inlined_call_operand.vmem [shape: f32[32,32], index: 20, kind: input, shape index: {}]   ;;  %s4228_s21 = inlined_call_operand.hbm [shape: f32[2,32], index: 21, kind: output, shape index: {}]  }
   0x1   :  { %4235 = sst [smem:[#allocation7_spill]] %s4207_s0 }
   0x2   :  { %4236 = sst [smem:[#allocation8_spill]] %s4208_s1 }
   0x3   :  { %4237 = sst [smem:[#allocation9_spill]] %s4209_s2 }
   0x4   :  { %4238 = sst [smem:[#allocation10_spill]] %s4210_s3 }
   0x5   :  { %4239 = sst [smem:[#allocation11_spill]] %s4211_s4 }
   0x6   :  { %4240 = sst [smem:[#allocation12_spill]] %s4212_s5 }
   0x7   :  { %4241 = sst [smem:[#allocation13_spill]] %s4215_s8 }
   0x8   :  { %4242 = sst [smem:[#allocation14_spill]] %s4217_s10 }
   0x9   :  { %4243 = sst [smem:[#allocation15_spill]] %s4225_s18 }
   0xa   :  { %4244 = sst [smem:[#allocation16_spill]] %s4226_s19 }
   0xb   :  { %4245 = sst [smem:[#allocation17_spill]] %s4227_s20 }
   0xc   :  { %4246 = sst [smem:[#allocation18_spill]] %s4228_s21 }
   0xd   :  { %26 = vsyncpa [#allocation4], 0  ;;  %s3713_s2 = smov 0  }
   0xe LB: > { %4247 = sst [smem:[#allocation6_spill]] %s3581_s2  ;;  %s3719_s25 = sadd.s32 4294967295, %s3581_s2   ;;  %s3581_s2 = sphi %s3713_s2, %s32_s2  }
   0xf   : > { %p3154_p0 = scmp.ge.s32.totalorder %s3581_s2, 1  ;;  %p677_p1 = scmp.lt.s32.totalorder %s3581_s2, 3 }
  0x11   : > { %p678_p2 = pnand %p3154_p0, %p677_p1 }
  0x12   : > { %p771_p3 = scmp.lt.s32.totalorder (!%p678_p2), %s3719_s25, 1  ;;  %s4248_s8 = sld [smem:[#allocation13_spill]] (!%p678_p2) }
  0x13   : > { %681 = sbr.rel (%p678_p2) target bundleno = 3764 (0xeb4), region = 104  ;;  %s4249_s10 = sld [smem:[#allocation14_spill]] (!%p678_p2) }
  0x14   : > { %p3163_p4 = scmp.ne.s32.totalorder (!%p678_p2), %s3719_s25, 0 }
  0x18   : > { %s3725_s26 = scalar_select %p771_p3, %s3719_s25, 1 }
  0x19   : > { %s4250_s1 = sld [smem:[#allocation8_spill]] (!%p3163_p4) }
  0x1a   : > { %s3223_s30 = sshll.u32 %s3725_s26, 5  ;;  %s795_s18 = scalar_lea.vmem %s4219_s12, %s3725_s26 }
  0x1b   : > { %s3743_s27 = scalar_lea.vmem %s4248_s8, %s3223_s30  ;;  %s3748_s21 = scalar_lea.vmem %s4249_s10, %s3223_s30 }
  0x1c   : > { %s798_s23 = scalar_lea.vmem %s4220_s13, %s3725_s26  ;;  %s3765_s8 = scalar_lea.vmem %s4221_s14, %s3223_s30 }
  0x1d   : > { %s806_s10 = scalar_lea.vmem %s4222_s15, %s3725_s26  ;;  %s3226_s20 = sshll.u32 %s3725_s26, 7 }
  0x1e   : > { %s3775_s29 = scalar_lea.vmem %s4223_s16, %s3226_s20  ;;  %818 = sbr.rel (%p3163_p4) target bundleno = 595 (0x253), region = 108 }
  0x1f   : > { %s4251_s24 = sld [smem:[#allocation7_spill]] (!%p3163_p4) }
  0x20   : > { %s4252_s0 = sld [smem:[#allocation9_spill]] (!%p3163_p4) }
  0x21   : > { %s4253_s3 = sld [smem:[#allocation10_spill]] (!%p3163_p4) }
  0x22   : > { %s4254_s4 = sld [smem:[#allocation11_spill]] (!%p3163_p4) }
  0x23   : > { %v836_v0 = vld [vmem:[%s4250_s1 + $0x78] sm:$0xff]  ;;  %v3583_v1 = vmov 0.0   ;;  %v835_v2 = vld [vmem:[%s4250_s1 + $0x70] sm:$0xff]  ;;  %v834_v3 = vld [vmem:[%s4250_s1 + $0x68] sm:$0xff]  ;;  %vm845_vm0 = vcmask 523264   ;;  %vm923_vm1 = vcmask 1040384  }
  0x24   : > { %849 = vmatprep.subr.mxu0 %v3583_v1  ;;  %v833_v4 = vld [vmem:[%s4250_s1 + $0x60] sm:$0xff]  ;;  %v832_v5 = vld [vmem:[%s4250_s1 + $0x58] sm:$0xff]  ;;  %v831_v7 = vld [vmem:[%s4250_s1 + $0x50] sm:$0xff]  ;;  %vm929_vm2 = vcmask 258048   ;;  %s4255_s2 = sld [smem:[#allocation12_spill]] }
  0x25   : > { %850 = vmatpush1.msra.mxu0 %v836_v0  ;;  %v820_v6 = vld [vmem:[%s4251_s24 + $0x8] sm:$0xff]  ;;  %v829_v9 = vld [vmem:[%s4250_s1 + $0x40] sm:$0xff]  ;;  %v828_v10 = vld [vmem:[%s4250_s1 + $0x38] sm:$0xff] }
  0x26   : > { %851 = vmatprep.subr.mxu0 %v3583_v1  ;;  %3164 = vmatprep.mubr.msk.f32.mxu0 %vm845_vm0, %v820_v6  ;;  %v830_v8 = vld [vmem:[%s4250_s1 + $0x48] sm:$0xff]  ;;  %v827_v11 = vld [vmem:[%s4250_s1 + $0x30] sm:$0xff]  ;;  %v825_v13 = vld [vmem:[%s4250_s1 + $0x20] sm:$0xff] }
  0x27   : > { %852 = vmatpush1.msra.mxu0 %v835_v2  ;;  %v826_v12 = vld [vmem:[%s4250_s1 + $0x28] sm:$0xff]  ;;  %v824_v14 = vld [vmem:[%s4250_s1 + $0x18] sm:$0xff]  ;;  %v823_v15 = vld [vmem:[%s4250_s1 + $0x10] sm:$0xff] }
  0x28   : > { %853 = vmatprep.subr.mxu0 %v3583_v1  ;;  %v822_v16 = vld [vmem:[%s4250_s1 + $0x8] sm:$0xff]  ;;  %v821_v17 = vld [vmem:[%s4250_s1] sm:$0xff]  ;;  %v844_v18 = vld [vmem:[%s4250_s1 + $0xb8] sm:$0xff] }
  0x29   : > { %854 = vmatpush1.msra.mxu0 %v834_v3  ;;  %v843_v19 = vld [vmem:[%s4250_s1 + $0xb0] sm:$0xff]  ;;  %v842_v20 = vld [vmem:[%s4250_s1 + $0xa8] sm:$0xff]  ;;  %v841_v21 = vld [vmem:[%s4250_s1 + $0xa0] sm:$0xff] }
  0x2a   : > { %855 = vmatprep.subr.mxu0 %v3583_v1  ;;  %v840_v22 = vld [vmem:[%s4250_s1 + $0x98] sm:$0xff]  ;;  %v839_v23 = vld [vmem:[%s4250_s1 + $0x90] sm:$0xff]  ;;  %v838_v24 = vld [vmem:[%s4250_s1 + $0x88] sm:$0xff] }
  0x2b   : > { %856 = vmatpush1.msra.mxu0 %v833_v4  ;;  %v837_v25 = vld [vmem:[%s4250_s1 + $0x80] sm:$0xff] }
  0x2c   : > { %857 = vmatprep.subr.mxu0 %v3583_v1  ;;  %v819_v26 = vld [vmem:[%s4251_s24] sm:$0xff] }
  0x2d   : > { %858 = vmatpush1.msra.mxu0 %v832_v5  ;;  %v919_v28 = vld [vmem:[%s4252_s0] sm:$0x1] }
  0x2e   : > { %859 = vmatprep.subr.mxu0 %v3583_v1  ;;  %v959_v29 = vld [vmem:[%s4252_s0] sm:$0x1] }
  0x2f   : > { %860 = vmatpush1.msra.mxu0 %v831_v7  ;;  %v925_v32 = vld [vmem:[%s4253_s3] sm:$0x1f] }
  0x30   : > { %861 = vmatprep.subr.mxu0 %v3583_v1  ;;  %v963_v36 = vld [vmem:[%s4253_s3] sm:$0x1f] }
  0x31   : > { %862 = vmatpush1.msra.mxu0 %v830_v8  ;;  %v3165_v58 = vld [vmem:[%s4254_s4] ss:$0 sm:$0xff] }
  0x32   : > { %863 = vmatprep.subr.mxu0 %v3583_v1  ;;  %v3166_v60 = vld [vmem:[%s4255_s2] ss:$0 sm:$0xff] }
  0x33   : > { %864 = vmatpush1.msra.mxu0 %v829_v9 }
  0x34   : > { %865 = vmatprep.subr.mxu0 %v3583_v1 }
  0x35   : > { %866 = vmatpush1.msra.mxu0 %v828_v10 }
  0x36   : > { %867 = vmatprep.subr.mxu0 %v3583_v1 }
  0x37   : > { %868 = vmatpush1.msra.mxu0 %v827_v11 }
  0x38   : > { %869 = vmatprep.subr.mxu0 %v3583_v1 }
  0x39   : > { %870 = vmatpush1.msra.mxu0 %v826_v12 }
  0x3a   : > { %871 = vmatprep.subr.mxu0 %v3583_v1 }
  0x3b   : > { %872 = vmatpush1.msra.mxu0 %v825_v13 }
  0x3c   : > { %873 = vmatprep.subr.mxu0 %v3583_v1 }
  0x3d   : > { %874 = vmatpush1.msra.mxu0 %v824_v14 }
  0x3e   : > { %875 = vmatprep.subr.mxu0 %v3583_v1 }
  0x3f   : > { %876 = vmatpush1.msra.mxu0 %v823_v15 }
  0x40   : > { %877 = vmatprep.subr.mxu0 %v3583_v1 }
  0x41   : > { %878 = vmatpush1.msra.mxu0 %v822_v16 }
  0x42   : > { %879 = vmatprep.subr.mxu0 %v3583_v1 }
  0x43   : > { %880 = vmatpush1.msra.mxu0 %v821_v17 }
  0x44   : > { %897 = vmatprep.subr.mxu0 %v3583_v1 }
  0x45   : > { %898 = vmatpush2.msra.mxu0 %v844_v18 }
  0x46   : > { %899 = vmatprep.subr.mxu0 %v3583_v1 }
  0x47   : > { %900 = vmatpush2.msra.mxu0 %v843_v19 }
  0x48   : > { %901 = vmatprep.subr.mxu0 %v3583_v1 }
  0x49   : > { %902 = vmatpush2.msra.mxu0 %v842_v20 }
  0x4a   : > { %903 = vmatprep.subr.mxu0 %v3583_v1 }
  0x4b   : > { %904 = vmatpush2.msra.mxu0 %v841_v21 }
  0x4c   : > { %905 = vmatprep.subr.mxu0 %v3583_v1 }
  0x4d   : > { %906 = vmatpush2.msra.mxu0 %v840_v22 }
  0x4e   : > { %907 = vmatprep.subr.mxu0 %v3583_v1 }
  0x4f   : > { %908 = vmatpush2.msra.mxu0 %v839_v23 }
  0x50   : > { %909 = vmatprep.subr.mxu0 %v3583_v1 }
  0x51   : > { %910 = vmatpush2.msra.mxu0 %v838_v24 }
  0x52   : > { %911 = vmatprep.subr.mxu0 %v3583_v1 }
  0x53   : > { %912 = vmatpush2.msra.mxu0 %v837_v25 }
  0x54   : > { %914 = vmatmul.mubr.f32.vlgmr.msra.gmra.mxu0 %v819_v26 }
 0x114   : > { %v915_v27 = vpop.f32.mrf.mxu0 }
 0x115   : > { %v921_v30 = vrot.slane %v915_v27, 7  ;;  %v960_v31 = vrot.slane %v915_v27, 3 }
 0x116   : > { %v917_v33 = vpop.f32.mrf.mxu0 }
 0x117   : > { %v924_v34 = vsel %vm923_vm1, %v919_v28, %v921_v30  ;;  %v962_v35 = vsel %vm923_vm1, %v959_v29, %v960_v31 }
 0x118   : > { %v926_v37 = vadd.f32 %v925_v32, %v924_v34  ;;  %v964_v39 = vadd.f32 %v963_v36, %v962_v35 }
 0x11a   : > { %v930_v38 = vsel %vm929_vm2, %v926_v37, 0.0  ;;  %v967_v40 = vsel %vm929_vm2, %v964_v39, 0.0 }
 0x11b   : > { %931 = vadd.xlane.f32.xlu0 %v930_v38 }
 0x11f   : > { %968 = vadd.xlane.f32.xlu0 %v967_v40 }
 0x1a4   : > { %v932_v41 = vpop.xlane.xlu0 %931 }
 0x1a5   : > { %v934_v42 = vmul.f32 0.03125, %v932_v41 }
 0x1a7   : > { %v935_v43 = vsub.f32 %v926_v37, %v934_v42 }
 0x1a8   : > { %v969_v44 = vpop.xlane.xlu0 %968 }
 0x1a9   : > { %v970_v45 = vmul.f32 0.03125, %v969_v44  ;;  %v936_v46 = vmul.f32 %v935_v43, %v935_v43 }
 0x1ab   : > { %v971_v47 = vsub.f32 %v964_v39, %v970_v45  ;;  %v937_v48 = vsel %vm929_vm2, %v936_v46, 0.0 }
 0x1ac   : > { %938 = vadd.xlane.f32.xlu1 %v937_v48 }
 0x1ad   : > { %v972_v49 = vmul.f32 %v971_v47, %v971_v47 }
 0x1af   : > { %v973_v50 = vsel %vm929_vm2, %v972_v49, 0.0 }
 0x1b0   : > { %974 = vadd.xlane.f32.xlu1 %v973_v50 }
 0x235   : > { %v939_v51 = vpop.xlane.xlu1 %938 }
 0x236   : > { %v940_v52 = vmul.f32 0.03125, %v939_v51 }
 0x238   : > { %v941_v53 = vadd.f32 1e-05, %v940_v52 }
 0x239   : > { %v975_v54 = vpop.xlane.xlu1 %974 }
 0x23a   : > { %3493 = vrsqrt.f32 %v941_v53  ;;  %v976_v55 = vmul.f32 0.03125, %v975_v54 }
 0x23c   : > { %v977_v56 = vadd.f32 1e-05, %v976_v55 }
 0x23e   : > { %3495 = vrsqrt.f32 %v977_v56 }
 0x247   : > { %v3494_v57 = vpop.eup %3493 }
 0x248   : > { %v943_v59 = vmul.f32 %v3494_v57, %v935_v43 }
 0x24a   : > { %v950_v61 = vmul.f32 %v3165_v58, %v943_v59 }
 0x24b   : > { %v3496_v62 = vpop.eup %3495 }
 0x24c   : > { %v957_v63 = vadd.f32 %v3166_v60, %v950_v61  ;;  %v979_v0 = vmul.f32 %v3496_v62, %v971_v47 }
 0x24e   : > { %958 = vst.msk [vmem:[#allocation2] sm:$0x1f] %vm929_vm2, %v957_v63  ;;  %v986_v1 = vmul.f32 %v3165_v58, %v979_v0 }
 0x250   : > { %v993_v2 = vadd.f32 %v3166_v60, %v986_v1 }
 0x252   : > { %994 = vst.msk [vmem:[#allocation2 + $0x5] sm:$0x1f] %vm929_vm2, %v993_v2 }
 0x253 PF: > { %vm1033_vm3 = vcmask 261120   ;;  %vm1037_vm4 = vcmask 254976   ;;  %v1002_v17 = vld [vmem:[%s3743_s27 + $0x18] sm:$0xff]  ;;  %v1001_v18 = vld [vmem:[%s3743_s27 + $0x10] sm:$0xff]  ;;  %v1000_v19 = vld [vmem:[%s3743_s27 + $0x8] sm:$0xff]  ;;  %s4256_s5 = scalar_lea.vmem %s4213_s6, %s3725_s26  ;;  %v3584_v37 = vmov 0.0   ;;  %s4258_s2 = scalar_lea.vmem %s4216_s9, %s3725_s26 }
 0x254   : > { %3300 = vmatprep.subr.mxu1 %v1002_v17  ;;  %v999_v20 = vld [vmem:[%s3743_s27] sm:$0xff]  ;;  %s4257_s27 = scalar_lea.vmem %s4214_s7, %s3725_s26  ;;  %3321 = vmatprep.subr.mxu0 %v3584_v37  ;;  %vm3585_vm5 = vmmov 0   ;;  %s3586_s20 = smov 88   ;;  %vm1854_vm6 = vcmask 1042432   ;;  %vm1168_vm7 = vcmask 64512   ;;  %vm1244_vm8 = vcmask 36864  }
 0x255   : > { %3301 = vmatpush3.msra.mxu1 %v1002_v17  ;;  %v3169_v28 = vld [vmem:[%s4256_s5] ss:$0 sm:$0xff]  ;;  %3323 = vmatprep.mubr.msk.f32.mxu0 %vm3585_vm5, %v3584_v37  ;;  %s3587_s19 = smov 96   ;;  %s3588_s5 = smov 120   ;;  %vm1262_vm9 = vcmask 1044480   ;;  %vm1258_vm10 = vcmask 39936  }
 0x256   : > { %3302 = vmatprep.subr.mxu1 %v1001_v18  ;;  %v3170_v30 = vld [vmem:[%s4257_s27] ss:$0 sm:$0xff]  ;;  %s3589_s28 = smov 112   ;;  %s3590_s4 = smov 80   ;;  %vm1849_vm11 = vcmask 130048   ;;  %vm1851_vm12 = vcmask 195584  }
 0x257   : > { %3303 = vmatpush3.msra.mxu1 %v1001_v18  ;;  %v3171_v39 = vld [vmem:[%s4258_s2] ss:$0 sm:$0xff]  ;;  %s3591_s27 = smov 104   ;;  %s3592_s22 = smov 72  }
 0x258   : > { %3304 = vmatprep.subr.mxu1 %v1000_v19  ;;  %s3593_s30 = smov 64   ;;  %s3594_s2 = smov 48  }
 0x259   : > { %v3908_v3 = vld [vmem:[#allocation2] sm:$0xff]  ;;  %v3910_v4 = vld [vmem:[#allocation2 + $0x8] sm:$0x3]  ;;  %3305 = vmatpush3.msra.mxu1 %v1000_v19  ;;  %p3215_p5 = scmp.ne.s32.totalorder %s3719_s25, 1 }
 0x25a   : > { %v1034_v5 = vsel %vm1033_vm3, %v3908_v3, 0.0  ;;  %v1038_v6 = vsel %vm1037_vm4, %v3910_v4, 0.0  ;;  %3306 = vmatprep.subr.mxu1 %v999_v20 }
 0x25b   : > { %1035 = vadd.xlane.f32.xlu0 %v1034_v5  ;;  %3307 = vmatpush3.msra.mxu1 %v999_v20 }
 0x25c   : > { %3311 = vmatprep.subr.mxu1 %v3584_v37 }
 0x25f   : > { %1039 = vadd.xlane.f32.xlu0 %v1038_v6 }
 0x2e4   : > { %v1036_v7 = vpop.xlane.xlu0 %1035 }
 0x2e5   : > { %v1042_v8 = vmul.f32 0.03125, %v1036_v7 }
 0x2e7   : > { %v1044_v9 = vsub.f32 %v3908_v3, %v1042_v8 }
 0x2e8   : > { %v1040_v10 = vpop.xlane.xlu0 %1039 }
 0x2e9   : > { %v1043_v11 = vmul.f32 0.03125, %v1040_v10  ;;  %v1046_v12 = vmul.f32 %v1044_v9, %v1044_v9 }
 0x2eb   : > { %v1045_v13 = vsub.f32 %v3910_v4, %v1043_v11  ;;  %v1048_v14 = vsel %vm1033_vm3, %v1046_v12, 0.0 }
 0x2ec   : > { %1049 = vadd.xlane.f32.xlu1 %v1048_v14 }
 0x2ed   : > { %v1047_v15 = vmul.f32 %v1045_v13, %v1045_v13 }
 0x2ef   : > { %v1051_v16 = vsel %vm1037_vm4, %v1047_v15, 0.0 }
 0x2f0   : > { %1052 = vadd.xlane.f32.xlu1 %v1051_v16 }
 0x375   : > { %v1050_v21 = vpop.xlane.xlu1 %1049 }
 0x376   : > { %v1054_v22 = vmul.f32 0.03125, %v1050_v21 }
 0x378   : > { %v1056_v23 = vadd.f32 1e-05, %v1054_v22 }
 0x379   : > { %v1053_v24 = vpop.xlane.xlu1 %1052 }
 0x37a   : > { %3497 = vrsqrt.f32 %v1056_v23  ;;  %v1055_v25 = vmul.f32 0.03125, %v1053_v24 }
 0x37c   : > { %v1057_v26 = vadd.f32 1e-05, %v1055_v25 }
 0x37e   : > { %3499 = vrsqrt.f32 %v1057_v26 }
 0x387   : > { %v3498_v27 = vpop.eup %3497 }
 0x388   : > { %v1060_v29 = vmul.f32 %v3498_v27, %v1044_v9 }
 0x38a   : > { %v1068_v31 = vmul.f32 %v3169_v28, %v1060_v29 }
 0x38b   : > { %v3500_v32 = vpop.eup %3499 }
 0x38c   : > { %v1061_v33 = vmul.f32 %v3500_v32, %v1045_v13  ;;  %v1076_v34 = vadd.f32 %v3170_v30, %v1068_v31 }
 0x38e   : > { %v1069_v35 = vmul.f32 %v3169_v28, %v1061_v33  ;;  %3308 = vmatprep.mubr.msk.f32.mxu1 %vm1033_vm3, %v1076_v34 }
 0x390   : > { %v1077_v36 = vadd.f32 %v3170_v30, %v1069_v35 }
 0x392   : > { %3309 = vmatmul.mubr.msk.f32.vlgmr.msra.gmra.mxu1 %vm1033_vm3, %v1077_v36 }
 0x393   : > { %3313 = vmatprep.mubr.msk.f32.mxu1 %vm3585_vm5, %v3584_v37 }
 0x452   : > { %v3310_v38 = vpop.f32.mrf.mxu1 }
 0x453   : > { %v1162_v42 = vadd.f32 %v3310_v38, %v3171_v39 }
 0x454   : > { %v1156_v40 = vpop.f32.mrf.mxu1 }
 0x455   : > { %v3947_v41 = vadd.f32 %v3171_v39, %v1156_v40  ;;  %v1856_v44 = vrot.slane %v1162_v42, 5 }
 0x457   : > { %1337 = vrot.lane.b32.xlu1 %v3947_v41, %s3586_s20  ;;  %1166 = vrot.lane.b32.xlu0 %v3947_v41, %s3587_s19  ;;  %v1855_v43 = vrot.slane %v3947_v41, 5 }
 0x459   : > { %v3956_v45 = vsel %vm1854_vm6, %v1855_v43, %v1856_v44 }
 0x45b   : > { %1335 = vrot.lane.b32.xlu1 %v3947_v41, %s3588_s5  ;;  %1502 = vrot.lane.b32.xlu0 %v3947_v41, %s3589_s28 }
 0x45f   : > { %1504 = vrot.lane.b32.xlu1 %v3947_v41, %s3590_s4  ;;  %1669 = vrot.lane.b32.xlu0 %v3947_v41, %s3591_s27 }
 0x463   : > { %1671 = vrot.lane.b32.xlu1 %v3947_v41, %s3592_s22  ;;  %2025 = vrot.lane.b32.xlu0 %v3956_v45, %s3586_s20  ;;  %s3595_s20 = smov 40  }
 0x467   : > { %2192 = vrot.lane.b32.xlu0 %v3956_v45, %s3590_s4  ;;  %1858 = vrot.lane.b32.xlu1 %v3956_v45, %s3587_s19  ;;  %s3596_s19 = smov 56   ;;  %s3599_s4 = smov 24  }
 0x46b   : > { %2359 = vrot.lane.b32.xlu0 %v3956_v45, %s3592_s22  ;;  %2023 = vrot.lane.b32.xlu1 %v3956_v45, %s3588_s5  ;;  %s3597_s5 = smov 8   ;;  %s4259_s22 = scalar_lea.vmem %s4218_s11, %s3725_s26 }
 0x46f   : > { %2190 = vrot.lane.b32.xlu1 %v3956_v45, %s3589_s28  ;;  %s3598_s28 = smov 16  }
 0x473   : > { %2357 = vrot.lane.b32.xlu1 %v3956_v45, %s3591_s27 }
 0x4c9   : > { %v1338_v46 = vpop.permute.xlu1 %1337  ;;  %v1167_v47 = vpop.permute.xlu0 %1166 }
 0x4ca   : > { %3312 = vmatpush3.xpose.msk.msra.mxu1 %vm1168_vm7, %v1167_v47  ;;  %3322 = vmatpush3.xpose.msk.msra.mxu0 %vm1168_vm7, %v1338_v46 }
 0x4cb   : > { %3331 = vmatprep.subr.mxu0 %v3584_v37  ;;  %3316 = vmatprep.subr.mxu1 %v3584_v37 }
 0x4cd   : > { %v1336_v48 = vpop.permute.xlu1 %1335  ;;  %3314 = vmatmul.mubr.msk.f32.vlgmr.msra.gmra.mxu1 %vm1168_vm7, %v3947_v41  ;;  %v1503_v49 = vpop.permute.xlu0 %1502 }
 0x4ce   : > { %3324 = vmatmul.mubr.msk.f32.vlgmr.msra.gmra.mxu0 %vm1168_vm7, %v1336_v48  ;;  %3318 = vmatprep.mubr.msk.f32.mxu1 %vm3585_vm5, %v3584_v37 }
 0x4cf   : > { %3333 = vmatprep.mubr.msk.f32.mxu0 %vm3585_vm5, %v3584_v37 }
 0x4d1   : > { %v1505_v50 = vpop.permute.xlu1 %1504  ;;  %v1670_v51 = vpop.permute.xlu0 %1669 }
 0x4d2   : > { %3332 = vmatpush3.xpose.msk.msra.mxu0 %vm1168_vm7, %v1505_v50 }
 0x4d3   : > { %3341 = vmatprep.subr.mxu0 %v3584_v37 }
 0x4d5   : > { %v1672_v52 = vpop.permute.xlu1 %1671  ;;  %3334 = vmatmul.mubr.msk.f32.vlgmr.msra.gmra.mxu0 %vm1168_vm7, %v1503_v49  ;;  %v2026_v53 = vpop.permute.xlu0 %2025 }
 0x4d6   : > { %3342 = vmatpush3.xpose.msk.msra.mxu0 %vm1168_vm7, %v1672_v52  ;;  %3343 = vmatprep.mubr.msk.f32.mxu0 %vm3585_vm5, %v3584_v37 }
 0x4d7   : > { %3351 = vmatprep.subr.mxu0 %v3584_v37 }
 0x4d9   : > { %3344 = vmatmul.mubr.msk.f32.vlgmr.msra.gmra.mxu0 %vm1168_vm7, %v1670_v51  ;;  %v1859_v54 = vpop.permute.xlu1 %1858  ;;  %v2193_v56 = vpop.permute.xlu0 %2192 }
 0x4da   : > { %3352 = vmatpush3.xpose.msk.msra.mxu0 %vm1168_vm7, %v1859_v54  ;;  %3353 = vmatprep.mubr.msk.f32.mxu0 %vm3585_vm5, %v3584_v37 }
 0x4db   : > { %3361 = vmatprep.subr.mxu0 %v3584_v37 }
 0x4dd   : > { %3354 = vmatmul.mubr.msk.f32.vlgmr.msra.gmra.mxu0 %vm1168_vm7, %v3956_v45  ;;  %v2024_v55 = vpop.permute.xlu1 %2023  ;;  %v2360_v58 = vpop.permute.xlu0 %2359 }
 0x4de   : > { %3362 = vmatpush3.xpose.msk.msra.mxu0 %vm1168_vm7, %v2026_v53  ;;  %3363 = vmatprep.mubr.msk.f32.mxu0 %vm3585_vm5, %v3584_v37 }
 0x4df   : > { %3371 = vmatprep.subr.mxu0 %v3584_v37 }
 0x4e1   : > { %3364 = vmatmul.mubr.msk.f32.vlgmr.msra.gmra.mxu0 %vm1168_vm7, %v2024_v55  ;;  %v2191_v57 = vpop.permute.xlu1 %2190 }
 0x4e2   : > { %3372 = vmatpush3.xpose.msk.msra.mxu0 %vm1168_vm7, %v2193_v56  ;;  %3373 = vmatprep.mubr.msk.f32.mxu0 %vm3585_vm5, %v3584_v37 }
 0x4e3   : > { %3381 = vmatprep.subr.mxu0 %v3584_v37 }
 0x4e5   : > { %3374 = vmatmul.mubr.msk.f32.vlgmr.msra.gmra.mxu0 %vm1168_vm7, %v2191_v57  ;;  %v2358_v59 = vpop.permute.xlu1 %2357 }
 0x4e6   : > { %3382 = vmatpush3.xpose.msk.msra.mxu0 %vm1168_vm7, %v2360_v58  ;;  %3383 = vmatprep.mubr.msk.f32.mxu0 %vm3585_vm5, %v3584_v37 }
 0x4e9   : > { %3384 = vmatmul.mubr.msk.f32.vlgmr.msra.gmra.mxu0 %vm1168_vm7, %v2358_v59 }
 0x58d   : > { %v1239_v60 = vpop.f32.mrf.mxu1 }
 0x58e   : > { %v1243_v61 = vmul.f32 0.35355338, %v1239_v60  ;;  %v1409_v62 = vpop.f32.mrf.mxu0 }
 0x58f   : > { %v1413_v63 = vmul.f32 0.35355338, %v1409_v62  ;;  %v3315_v0 = vpop.f32.mrf.mxu1 }
 0x590   : > { %v3325_v1 = vpop.f32.mrf.mxu0  ;;  %v1245_v2 = vsel %vm1244_vm8, %v1243_v61, -inf }
 0x591   : > { %1246 = vmax.xlane.f32.xlu0 %v1245_v2  ;;  %v1414_v5 = vsel %vm1244_vm8, %v1413_v63, -inf }
 0x592   : > { %1415 = vmax.xlane.f32.xlu1 %v1414_v5 }
 0x595   : > { %v1576_v6 = vpop.f32.mrf.mxu0 }
 0x596   : > { %v4007_v7 = vmul.f32 0.35355338, %v1576_v6 }
 0x597   : > { %v3335_v8 = vpop.f32.mrf.mxu0 }
 0x598   : > { %v1581_v9 = vsel %vm1244_vm8, %v4007_v7, -inf }
 0x599   : > { %v1743_v10 = vpop.f32.mrf.mxu0  ;;  %1582 = vmax.xlane.f32.xlu0 %v1581_v9 }
 0x59a   : > { %v1747_v11 = vmul.f32 0.35355338, %v1743_v10 }
 0x59b   : > { %v3345_v12 = vpop.f32.mrf.mxu0 }
 0x59c   : > { %v1748_v13 = vsel %vm1244_vm8, %v1747_v11, -inf }
 0x59d   : > { %1749 = vmax.xlane.f32.xlu0 %v1748_v13  ;;  %v1930_v14 = vpop.f32.mrf.mxu0 }
 0x59e   : > { %v1934_v15 = vmul.f32 0.35355338, %v1930_v14 }
 0x59f   : > { %v3355_v16 = vpop.f32.mrf.mxu0 }
 0x5a0   : > { %v1935_v17 = vsel %vm1244_vm8, %v1934_v15, -inf }
 0x5a1   : > { %1936 = vmax.xlane.f32.xlu0 %v1935_v17  ;;  %v2097_v18 = vpop.f32.mrf.mxu0 }
 0x5a2   : > { %v2101_v19 = vmul.f32 0.35355338, %v2097_v18 }
 0x5a3   : > { %v3365_v20 = vpop.f32.mrf.mxu0 }
 0x5a4   : > { %v2102_v21 = vsel %vm1244_vm8, %v2101_v19, -inf }
 0x5a5   : > { %2103 = vmax.xlane.f32.xlu1 %v2102_v21  ;;  %v2264_v22 = vpop.f32.mrf.mxu0 }
 0x5a6   : > { %v2268_v23 = vmul.f32 0.35355338, %v2264_v22 }
 0x5a7   : > { %v3375_v24 = vpop.f32.mrf.mxu0 }
 0x5a8   : > { %v2269_v25 = vsel %vm1244_vm8, %v2268_v23, -inf }
 0x5a9   : > { %2270 = vmax.xlane.f32.xlu0 %v2269_v25  ;;  %v2431_v26 = vpop.f32.mrf.mxu0 }
 0x5aa   : > { %v2435_v28 = vmul.f32 0.35355338, %v2431_v26 }
 0x5ab   : > { %v3385_v27 = vpop.f32.mrf.mxu0 }
 0x5ac   : > { %v2436_v29 = vsel %vm1244_vm8, %v2435_v28, -inf }
 0x5b6   : > { %1256 = vrot.lane.b32.xlu1 %v3947_v41, %s3593_s30 }
 0x5da   : > { %2437 = vmax.xlane.f32.xlu1 %v2436_v29 }
 0x5eb   : > { %1592 = vrot.lane.b32.xlu1 %v3947_v41, %s3594_s2 }
 0x5ef   : > { %1759 = vrot.lane.b32.xlu1 %v3947_v41, %s3595_s20 }
 0x5f3   : > { %1946 = vrot.lane.b32.xlu1 %v3956_v45, %s3593_s30 }
 0x61a   : > { %v1247_v30 = vpop.xlane.xlu0 %1246 }
 0x61b   : > { %v1248_v31 = vsub.f32 %v1243_v61, %v1247_v30  ;;  %v1416_v32 = vpop.xlane.xlu1 %1415 }
 0x61c   : > { %v1417_v33 = vsub.f32 %v1413_v63, %v1416_v32 }
 0x61d   : > { %v1249_v34 = vmul.f32 1.442695, %v1248_v31 }
 0x61e   : > { %v1418_v35 = vmul.f32 1.442695, %v1417_v33 }
 0x61f   : > { %3501 = vpow2.f32 %v1249_v34 }
 0x620   : > { %3503 = vpow2.f32 %v1418_v35 }
 0x622   : > { %v1583_v36 = vpop.xlane.xlu0 %1582 }
 0x623   : > { %v1584_v51 = vsub.f32 %v4007_v7, %v1583_v36 }
 0x625   : > { %v1585_v53 = vmul.f32 1.442695, %v1584_v51  ;;  %v1007_v51 = vld [vmem:[%s3748_s21 + $0x18] sm:$0xff] }
 0x626   : > { %v1750_v38 = vpop.xlane.xlu0 %1749 }
 0x627   : > { %v1751_v39 = vsub.f32 %v1747_v11, %v1750_v38 }
 0x629   : > { %v1752_v40 = vmul.f32 1.442695, %v1751_v39 }
 0x62a   : > { %v1937_v52 = vpop.xlane.xlu0 %1936 }
 0x62b   : > { %3505 = vpow2.f32 %v1752_v40  ;;  %v1938_v54 = vsub.f32 %v1934_v15, %v1937_v52 }
 0x62c   : > { %v3502_v42 = vpop.eup %3501  ;;  %3507 = vpow2.f32 %v1585_v53  ;;  %v1006_v53 = vld [vmem:[%s3748_s21 + $0x10] sm:$0xff] }
 0x62d   : > { %v4022_v43 = vpop.eup %3503  ;;  %v1251_v44 = vsel %vm1244_vm8, %v3502_v42, 0.0  ;;  %v1939_v56 = vmul.f32 1.442695, %v1938_v54  ;;  %v1005_v54 = vld [vmem:[%s3748_s21 + $0x8] sm:$0xff] }
 0x62e   : > { %1252 = vadd.xlane.f32.xlu0 %v1251_v44  ;;  %v2104_v46 = vpop.xlane.xlu1 %2103  ;;  %v1420_v47 = vsel %vm1244_vm8, %v4022_v43, 0.0 }
 0x62f   : > { %1421 = vadd.xlane.f32.xlu1 %v1420_v47  ;;  %3509 = vpow2.f32 %v1939_v56  ;;  %v2105_v58 = vsub.f32 %v2101_v19, %v2104_v46 }
 0x631   : > { %v2106_v60 = vmul.f32 1.442695, %v2105_v58 }
 0x632   : > { %v1257_v48 = vpop.permute.xlu1 %1256  ;;  %v2271_v55 = vpop.xlane.xlu0 %2270 }
 0x633   : > { %3317 = vmatpush3.msk.msra.mxu1 %vm1262_vm9, %v1257_v48  ;;  %v2272_v57 = vsub.f32 %v2268_v23, %v2271_v55 }
 0x634   : > { %3326 = vmatprep.subr.mxu1 %v3584_v37 }
 0x635   : > { %v2273_v59 = vmul.f32 1.442695, %v2272_v57  ;;  %v1004_v57 = vld [vmem:[%s3748_s21] sm:$0xff] }
 0x637   : > { %3511 = vpow2.f32 %v2273_v59 }
 0x638   : > { %v4029_v49 = vpop.eup %3505  ;;  %3513 = vpow2.f32 %v2106_v60 }
 0x639   : > { %v1754_v50 = vsel %vm1244_vm8, %v4029_v49, 0.0  ;;  %v3508_v61 = vpop.eup %3507 }
 0x63a   : > { %1755 = vadd.xlane.f32.xlu1 %v1754_v50 }
 0x63c   : > { %v4037_v62 = vpop.eup %3509 }
 0x63d   : > { %v1941_v2 = vsel %vm1244_vm8, %v4037_v62, 0.0 }
 0x644   : > { %1425 = vrot.lane.b32.xlu0 %v3947_v41, %s3596_s19  ;;  %v1587_v41 = vsel %vm1244_vm8, %v3508_v61, 0.0  ;;  %v4041_v5 = vpop.eup %3511 }
 0x645   : > { %v2275_v6 = vsel %vm1244_vm8, %v4041_v5, 0.0  ;;  %v3514_v7 = vpop.eup %3513 }
 0x646   : > { %v2108_v8 = vsel %vm1244_vm8, %v3514_v7, 0.0 }
 0x64b   : > { %2113 = vrot.lane.b32.xlu1 %v3956_v45, %s3596_s19  ;;  %s4260_s19 = scalar_lea.vmem %s4224_s17, %s3725_s26 }
 0x663   : > { %1588 = vadd.xlane.f32.xlu0 %v1587_v41  ;;  %v2438_v63 = vpop.xlane.xlu1 %2437 }
 0x664   : > { %v2439_v0 = vsub.f32 %v2435_v28, %v2438_v63 }
 0x666   : > { %v2440_v1 = vmul.f32 1.442695, %v2439_v0 }
 0x667   : > { %1942 = vadd.xlane.f32.xlu0 %v1941_v2  ;;  %v1593_v11 = vpop.permute.xlu1 %1592 }
 0x668   : > { %3515 = vpow2.f32 %v2440_v1 }
 0x66b   : > { %2276 = vadd.xlane.f32.xlu0 %v2275_v6  ;;  %v1760_v12 = vpop.permute.xlu1 %1759 }
 0x66f   : > { %2109 = vadd.xlane.f32.xlu1 %v2108_v8  ;;  %v1947_v13 = vpop.permute.xlu1 %1946 }
 0x675   : > { %v4046_v9 = vpop.eup %3515 }
 0x676   : > { %v2442_v10 = vsel %vm1244_vm8, %v4046_v9, 0.0 }
 0x677   : > { %2443 = vadd.xlane.f32.xlu0 %v2442_v10 }
 0x680   : > { %2447 = vrot.lane.b32.xlu1 %v3956_v45, %s3595_s20 }
 0x68d   : > { %2280 = vrot.lane.b32.xlu0 %v3956_v45, %s3594_s2 }
 0x6b7   : > { %v1253_v14 = vpop.xlane.xlu0 %1252 }
 0x6b8   : > { %3517 = vrcp.f32 %v1253_v14  ;;  %v1422_v15 = vpop.xlane.xlu1 %1421  ;;  %v3208_v14 = vld [vmem:[%s4259_s22] ss:$0 sm:$0xff] }
 0x6b9   : > { %3519 = vrcp.f32 %v1422_v15 }
 0x6bb   : > { %v1426_v19 = vpop.permute.xlu0 %1425 }
 0x6c3   : > { %v1756_v20 = vpop.xlane.xlu1 %1755 }
 0x6c5   : > { %v3518_v16 = vpop.eup %3517 }
 0x6c6   : > { %v1255_v17 = vmul.f32 %v3518_v16, %v3502_v42  ;;  %v3520_v18 = vpop.eup %3519 }
 0x6c7   : > { %v1424_v45 = vmul.f32 %v3520_v18, %v4022_v43  ;;  %v2114_v23 = vpop.permute.xlu1 %2113 }
 0x6c8   : > { %3319 = vmatmul.mubr.msk.f32.vlgmr.msra.gmra.mxu1 %vm1258_vm10, %v1255_v17 }
 0x6c9   : > { %3327 = vmatpush3.msk.msra.mxu1 %vm1262_vm9, %v1426_v19  ;;  %3328 = vmatprep.mubr.msk.f32.mxu1 %vm3585_vm5, %v3584_v37 }
 0x6ca   : > { %3336 = vmatprep.subr.mxu1 %v3584_v37 }
 0x6cc   : > { %3329 = vmatmul.mubr.msk.f32.vlgmr.msra.gmra.mxu1 %vm1258_vm10, %v1424_v45 }
 0x6cd   : > { %3337 = vmatpush3.msk.msra.mxu1 %vm1262_vm9, %v1593_v11  ;;  %3338 = vmatprep.mubr.msk.f32.mxu1 %vm3585_vm5, %v3584_v37 }
 0x6ce   : > { %3346 = vmatprep.subr.mxu1 %v3584_v37 }
 0x6ec   : > { %v1589_v21 = vpop.xlane.xlu0 %1588 }
 0x6ed   : > { %3521 = vrcp.f32 %v1589_v21 }
 0x6ee   : > { %3523 = vrcp.f32 %v1756_v20 }
 0x6f0   : > { %v1943_v22 = vpop.xlane.xlu0 %1942 }
 0x6f1   : > { %3525 = vrcp.f32 %v1943_v22 }
 0x6f4   : > { %v2277_v24 = vpop.xlane.xlu0 %2276 }
 0x6f8   : > { %v2110_v25 = vpop.xlane.xlu1 %2109 }
 0x6f9   : > { %3527 = vrcp.f32 %v2110_v25 }
 0x6fa   : > { %v3522_v26 = vpop.eup %3521  ;;  %3529 = vrcp.f32 %v2277_v24 }
 0x6fb   : > { %v1591_v27 = vmul.f32 %v3522_v26, %v3508_v61  ;;  %v3524_v28 = vpop.eup %3523 }
 0x6fc   : > { %v1758_v29 = vmul.f32 %v3524_v28, %v4029_v49  ;;  %v2448_v39 = vpop.permute.xlu1 %2447 }
 0x6fd   : > { %3339 = vmatmul.mubr.msk.f32.vlgmr.msra.gmra.mxu1 %vm1258_vm10, %v1591_v27 }
 0x6fe   : > { %3347 = vmatpush3.msk.msra.mxu1 %vm1262_vm9, %v1760_v12  ;;  %3348 = vmatprep.mubr.msk.f32.mxu1 %vm3585_vm5, %v3584_v37  ;;  %v3526_v30 = vpop.eup %3525 }
 0x6ff   : > { %3356 = vmatprep.subr.mxu1 %v3584_v37  ;;  %v1945_v32 = vmul.f32 %v3526_v30, %v4037_v62  ;;  %v1014_v30 = vld [vmem:[%s3765_s8 + $0x18] sm:$0xff] }
 0x700   : > { %v2444_v31 = vpop.xlane.xlu0 %2443 }
 0x701   : > { %3531 = vrcp.f32 %v2444_v31  ;;  %3349 = vmatmul.mubr.msk.f32.vlgmr.msra.gmra.mxu1 %vm1258_vm10, %v1758_v29  ;;  %v1013_v31 = vld [vmem:[%s3765_s8 + $0x10] sm:$0xff] }
 0x702   : > { %3357 = vmatpush3.msk.msra.mxu1 %vm1262_vm9, %v1947_v13  ;;  %3358 = vmatprep.mubr.msk.f32.mxu1 %vm3585_vm5, %v3584_v37 }
 0x703   : > { %3366 = vmatprep.subr.mxu1 %v3584_v37 }
 0x704   : > { %v2281_v36 = vpop.permute.xlu0 %2280 }
 0x705   : > { %3359 = vmatmul.mubr.msk.f32.vlgmr.msra.gmra.mxu1 %vm1258_vm10, %v1945_v32  ;;  %v1012_v32 = vld [vmem:[%s3765_s8 + $0x8] sm:$0xff] }
 0x706   : > { %v3528_v33 = vpop.eup %3527  ;;  %3367 = vmatpush3.msk.msra.mxu1 %vm1262_vm9, %v2114_v23  ;;  %3368 = vmatprep.mubr.msk.f32.mxu1 %vm3585_vm5, %v3584_v37 }
 0x707   : > { %3376 = vmatprep.subr.mxu1 %v3584_v37  ;;  %v2112_v34 = vmul.f32 %v3528_v33, %v3514_v7  ;;  %v3530_v35 = vpop.eup %3529  ;;  %v1011_v33 = vld [vmem:[%s3765_s8] sm:$0xff] }
 0x708   : > { %v2279_v38 = vmul.f32 %v3530_v35, %v4041_v5 }
 0x709   : > { %3369 = vmatmul.mubr.msk.f32.vlgmr.msra.gmra.mxu1 %vm1258_vm10, %v2112_v34 }
 0x70a   : > { %3377 = vmatpush3.msk.msra.mxu1 %vm1262_vm9, %v2281_v36  ;;  %3378 = vmatprep.mubr.msk.f32.mxu1 %vm3585_vm5, %v3584_v37 }
 0x70b   : > { %3386 = vmatprep.subr.mxu1 %v3584_v37 }
 0x70d   : > { %3379 = vmatmul.mubr.msk.f32.vlgmr.msra.gmra.mxu1 %vm1258_vm10, %v2279_v38 }
 0x70e   : > { %v3532_v40 = vpop.eup %3531  ;;  %3387 = vmatpush3.msk.msra.mxu1 %vm1262_vm9, %v2448_v39  ;;  %3388 = vmatprep.mubr.msk.f32.mxu1 %vm3585_vm5, %v3584_v37 }
 0x70f   : > { %v2446_v42 = vmul.f32 %v3532_v40, %v4046_v9  ;;  %3391 = vmatprep.subr.mxu1 %v1007_v51 }
 0x711   : > { %3389 = vmatmul.mubr.msk.f32.vlgmr.msra.gmra.mxu1 %vm1258_vm10, %v2446_v42 }
 0x712   : > { %3392 = vmatpush3.msra.mxu1 %v1007_v51 }
 0x713   : > { %3393 = vmatprep.subr.mxu1 %v1006_v53 }
 0x714   : > { %3394 = vmatpush3.msra.mxu1 %v1006_v53  ;;  %v1030_v53 = vld [vmem:[%s3775_s29 + $0x70] sm:$0xff] }
 0x715   : > { %3395 = vmatprep.subr.mxu1 %v1005_v54 }
 0x716   : > { %3396 = vmatpush3.msra.mxu1 %v1005_v54  ;;  %v1029_v54 = vld [vmem:[%s3775_s29 + $0x68] sm:$0xff] }
 0x717   : > { %3397 = vmatprep.subr.mxu1 %v1004_v57 }
 0x718   : > { %3398 = vmatpush3.msra.mxu1 %v1004_v57  ;;  %v1026_v57 = vld [vmem:[%s3775_s29 + $0x50] sm:$0xff] }
 0x719   : > { %3402 = vmatprep.subr.mxu1 %v1014_v30 }
 0x788   : > { %v1331_v43 = vpop.f32.mrf.mxu1 }
 0x78a   : > { %v3320_v44 = vpop.f32.mrf.mxu1 }
 0x78c   : > { %v1498_v46 = vpop.f32.mrf.mxu1 }
 0x78d   : > { %1837 = vrot.lane.b32.xlu0 %v1498_v46, %s3597_s5  ;;  %v3210_v46 = vld [vmem:[%s798_s23] ss:$0 sm:$0xff] }
 0x78e   : > { %v3330_v47 = vpop.f32.mrf.mxu1 }
 0x7bd   : > { %v1665_v48 = vpop.f32.mrf.mxu1 }
 0x7bf   : > { %v3340_v49 = vpop.f32.mrf.mxu1 }
 0x7c1   : > { %v1832_v50 = vpop.f32.mrf.mxu1 }
 0x7c3   : > { %v3350_v52 = vpop.f32.mrf.mxu1 }
 0x7c5   : > { %v2019_v37 = vpop.f32.mrf.mxu1 }
 0x7c7   : > { %v3360_v55 = vpop.f32.mrf.mxu1 }
 0x7c8   : > { %v1028_v55 = vld [vmem:[%s3775_s29 + $0x60] sm:$0xff] }
 0x7c9   : > { %v2186_v56 = vpop.f32.mrf.mxu1 }
 0x7ca   : > { %2525 = vrot.lane.b32.xlu0 %v2186_v56, %s3597_s5  ;;  %v1027_v56 = vld [vmem:[%s3775_s29 + $0x58] sm:$0xff] }
 0x7cb   : > { %v3370_v58 = vpop.f32.mrf.mxu1 }
 0x7cc   : > { %v1025_v58 = vld [vmem:[%s3775_s29 + $0x48] sm:$0xff] }
 0x7cd   : > { %v2353_v59 = vpop.f32.mrf.mxu1 }
 0x7ce   : > { %1841 = vrot.lane.b32.xlu0 %v1665_v48, %s3598_s28  ;;  %2529 = vrot.lane.b32.xlu1 %v2353_v59, %s3598_s28  ;;  %v1024_v59 = vld [vmem:[%s3775_s29 + $0x40] sm:$0xff]  ;;  %s4261_s28 = sld [smem:[#allocation17_spill]] (!%p3215_p5) }
 0x7cf   : > { %v3380_v60 = vpop.f32.mrf.mxu1 }
 0x7d0   : > { %v1023_v60 = vld [vmem:[%s3775_s29 + $0x38] sm:$0xff] }
 0x7d1   : > { %v2520_v61 = vpop.f32.mrf.mxu1 }
 0x7d2   : > { %2533 = vrot.lane.b32.xlu1 %v2520_v61, %s3599_s4  ;;  %v1022_v61 = vld [vmem:[%s3775_s29 + $0x30] sm:$0xff] }
 0x7d3   : > { %v3390_v41 = vpop.f32.mrf.mxu1 }
 0x7d4   : > { %v1021_v41 = vld [vmem:[%s3775_s29 + $0x28] sm:$0xff] }
 0x7d6   : > { %1845 = vrot.lane.b32.xlu1 %v1832_v50, %s3599_s4 }
 0x7ff   : > { %v1838_v62 = vpop.permute.xlu0 %1837 }
 0x800   : > { %v1848_v8 = vsel %vm1168_vm7, %v1331_v43, %v1838_v62  ;;  %v3209_v43 = vld [vmem:[%s795_s18] ss:$0 sm:$0xff]  ;;  %s4262_s18 = sld [smem:[#allocation15_spill]] (!%p3215_p5) }
 0x801   : > { %v1020_v62 = vld [vmem:[%s3775_s29 + $0x20] sm:$0xff] }
 0x83c   : > { %v2526_v63 = vpop.permute.xlu0 %2525 }
 0x83d   : > { %v2536_v1 = vsel %vm1168_vm7, %v2019_v37, %v2526_v63  ;;  %v1031_v37 = vld [vmem:[%s3775_s29 + $0x78] sm:$0xff] }
 0x83e   : > { %3413 = vmatprep.subr.mxu0 %v1031_v37  ;;  %v1019_v63 = vld [vmem:[%s3775_s29 + $0x18] sm:$0xff] }
 0x83f   : > { %3414 = vmatpush3.msra.mxu0 %v1031_v37 }
 0x840   : > { %v2530_v0 = vpop.permute.xlu1 %2529  ;;  %v1842_v6 = vpop.permute.xlu0 %1841  ;;  %3415 = vmatprep.subr.mxu0 %v1030_v53 }
 0x841   : > { %v2537_v2 = vsel %vm1849_vm11, %v2536_v1, %v2530_v0  ;;  %v1850_v9 = vsel %vm1849_vm11, %v1848_v8, %v1842_v6  ;;  %3416 = vmatpush3.msra.mxu0 %v1030_v53  ;;  %v1018_v0 = vld [vmem:[%s3775_s29 + $0x10] sm:$0xff]  ;;  %v1017_v1 = vld [vmem:[%s3775_s29 + $0x8] sm:$0xff] }
 0x842   : > { %3417 = vmatprep.subr.mxu0 %v1029_v54 }
 0x843   : > { %3418 = vmatpush3.msra.mxu0 %v1029_v54 }
 0x844   : > { %v2534_v5 = vpop.permute.xlu1 %2533  ;;  %3419 = vmatprep.subr.mxu0 %v1028_v55 }
 0x845   : > { %v2538_v7 = vsel %vm1851_vm12, %v2537_v2, %v2534_v5  ;;  %3420 = vmatpush3.msra.mxu0 %v1028_v55  ;;  %v1016_v2 = vld [vmem:[%s3775_s29] sm:$0xff]  ;;  %s4263_s29 = sld [smem:[#allocation16_spill]] (!%p3215_p5) }
 0x846   : > { %v2540_v10 = vrot.slane %v2538_v7, 3  ;;  %3421 = vmatprep.subr.mxu0 %v1027_v56  ;;  %v3211_v5 = vld [vmem:[%s806_s10] ss:$0 sm:$0xff] }
 0x847   : > { %3422 = vmatpush3.msra.mxu0 %v1027_v56 }
 0x848   : > { %v1846_v11 = vpop.permute.xlu1 %1845  ;;  %3423 = vmatprep.subr.mxu0 %v1026_v57 }
 0x849   : > { %v1852_v12 = vsel %vm1851_vm12, %v1850_v9, %v1846_v11  ;;  %3424 = vmatpush3.msra.mxu0 %v1026_v57 }
 0x84a   : > { %v2542_v13 = vsel %vm1262_vm9, %v1852_v12, %v2540_v10  ;;  %3425 = vmatprep.subr.mxu0 %v1025_v58 }
 0x84b   : > { %3399 = vmatprep.mubr.msk.f32.mxu1 %vm1033_vm3, %v2542_v13  ;;  %3426 = vmatpush3.msra.mxu0 %v1025_v58 }
 0x84c   : > { %3400 = vmatmul.mubr.msk.f32.vlgmr.msra.gmra.mxu1 %vm1033_vm3, %v2540_v10  ;;  %3427 = vmatprep.subr.mxu0 %v1024_v59 }
 0x84d   : > { %3403 = vmatpush3.msra.mxu1 %v1014_v30  ;;  %3428 = vmatpush3.msra.mxu0 %v1024_v59 }
 0x84e   : > { %3404 = vmatprep.subr.mxu1 %v1013_v31  ;;  %3429 = vmatprep.subr.mxu0 %v1023_v60 }
 0x84f   : > { %3405 = vmatpush3.msra.mxu1 %v1013_v31  ;;  %3430 = vmatpush3.msra.mxu0 %v1023_v60 }
 0x850   : > { %3406 = vmatprep.subr.mxu1 %v1012_v32  ;;  %3431 = vmatprep.subr.mxu0 %v1022_v61 }
 0x851   : > { %3407 = vmatpush3.msra.mxu1 %v1012_v32  ;;  %3432 = vmatpush3.msra.mxu0 %v1022_v61 }
 0x852   : > { %3408 = vmatprep.subr.mxu1 %v1011_v33  ;;  %3433 = vmatprep.subr.mxu0 %v1021_v41 }
 0x853   : > { %3409 = vmatpush3.msra.mxu1 %v1011_v33  ;;  %3434 = vmatpush3.msra.mxu0 %v1021_v41 }
 0x854   : > { %3435 = vmatprep.subr.mxu0 %v1020_v62 }
 0x855   : > { %3436 = vmatpush3.msra.mxu0 %v1020_v62 }
 0x856   : > { %3437 = vmatprep.subr.mxu0 %v1019_v63 }
 0x857   : > { %3438 = vmatpush3.msra.mxu0 %v1019_v63 }
 0x858   : > { %3439 = vmatprep.subr.mxu0 %v1018_v0 }
 0x859   : > { %3440 = vmatpush3.msra.mxu0 %v1018_v0 }
 0x85a   : > { %3441 = vmatprep.subr.mxu0 %v1017_v1 }
 0x85b   : > { %3442 = vmatpush3.msra.mxu0 %v1017_v1 }
 0x85c   : > { %3443 = vmatprep.subr.mxu0 %v1016_v2 }
 0x85d   : > { %3444 = vmatpush3.msra.mxu0 %v1016_v2 }
 0x90c   : > { %v3401_v15 = vpop.f32.mrf.mxu1 }
 0x90d   : > { %v2624_v16 = vadd.f32 %v3401_v15, %v3910_v4 }
 0x90e   : > { %v2614_v17 = vpop.f32.mrf.mxu1 }
 0x90f   : > { %v4109_v18 = vadd.f32 %v3208_v14, %v2624_v16  ;;  %v2623_v19 = vadd.f32 %v2614_v17, %v3908_v3 }
 0x911   : > { %v4112_v45 = vadd.f32 %v3208_v14, %v2623_v19  ;;  %v2636_v20 = vsel %vm1037_vm4, %v4109_v18, 0.0 }
 0x912   : > { %2637 = vadd.xlane.f32.xlu1 %v2636_v20 }
 0x913   : > { %v2633_v21 = vsel %vm1033_vm3, %v4112_v45, 0.0 }
 0x914   : > { %2634 = vadd.xlane.f32.xlu0 %v2633_v21 }
 0x99b   : > { %v2638_v22 = vpop.xlane.xlu1 %2637 }
 0x99c   : > { %v2640_v4 = vmul.f32 0.03125, %v2638_v22 }
 0x99d   : > { %v2635_v23 = vpop.xlane.xlu0 %2634 }
 0x99e   : > { %v2639_v24 = vmul.f32 0.03125, %v2635_v23  ;;  %v2642_v25 = vsub.f32 %v4109_v18, %v2640_v4 }
 0x9a0   : > { %v2641_v3 = vsub.f32 %v4112_v45, %v2639_v24  ;;  %v2644_v28 = vmul.f32 %v2642_v25, %v2642_v25 }
 0x9a2   : > { %v2643_v26 = vmul.f32 %v2641_v3, %v2641_v3  ;;  %v2648_v29 = vsel %vm1037_vm4, %v2644_v28, 0.0 }
 0x9a4   : > { %v2645_v27 = vsel %vm1033_vm3, %v2643_v26, 0.0 }
 0x9a5   : > { %2646 = vadd.xlane.f32.xlu0 %v2645_v27  ;;  %v3214_v27 = vld [vmem:[%s4260_s19] ss:$0 sm:$0xff] }
 0x9a9   : > { %2649 = vadd.xlane.f32.xlu0 %v2648_v29 }
 0xa2e   : > { %v2647_v34 = vpop.xlane.xlu0 %2646 }
 0xa2f   : > { %v2651_v35 = vmul.f32 0.03125, %v2647_v34 }
 0xa31   : > { %v2653_v36 = vadd.f32 1e-05, %v2651_v35 }
 0xa32   : > { %v2650_v38 = vpop.xlane.xlu0 %2649 }
 0xa33   : > { %3533 = vrsqrt.f32 %v2653_v36  ;;  %v2652_v39 = vmul.f32 0.03125, %v2650_v38 }
 0xa35   : > { %v2654_v40 = vadd.f32 1e-05, %v2652_v39 }
 0xa37   : > { %3535 = vrsqrt.f32 %v2654_v40 }
 0xa40   : > { %v3534_v42 = vpop.eup %3533 }
 0xa41   : > { %v2657_v44 = vmul.f32 %v3534_v42, %v2641_v3 }
 0xa43   : > { %v2665_v47 = vmul.f32 %v3209_v43, %v2657_v44 }
 0xa44   : > { %v3536_v48 = vpop.eup %3535 }
 0xa45   : > { %v2658_v49 = vmul.f32 %v3536_v48, %v2642_v25  ;;  %v2673_v50 = vadd.f32 %v3210_v46, %v2665_v47 }
 0xa47   : > { %v2666_v51 = vmul.f32 %v3209_v43, %v2658_v49  ;;  %3410 = vmatprep.mubr.msk.f32.mxu1 %vm1033_vm3, %v2673_v50 }
 0xa49   : > { %v2674_v52 = vadd.f32 %v3210_v46, %v2666_v51 }
 0xa4b   : > { %3411 = vmatmul.mubr.msk.f32.vlgmr.msra.gmra.mxu1 %vm1033_vm3, %v2674_v52 }
 0xb0b   : > { %v3412_v6 = vpop.f32.mrf.mxu1 }
 0xb0c   : > { %v2759_v7 = vadd.f32 %v3412_v6, %v3211_v5 }
 0xb0d   : > { %v2753_v8 = vpop.f32.mrf.mxu1 }
 0xb0e   : > { %v2765_v9 = vmul.f32 0.044715, %v2759_v7  ;;  %v2754_v10 = vadd.f32 %v3211_v5, %v2753_v8  ;;  %v2763_v25 = vmul.f32 0.5, %v2759_v7 }
 0xb10   : > { %v2767_v11 = vmul.f32 %v2765_v9, %v2759_v7  ;;  %v2764_v12 = vmul.f32 0.044715, %v2754_v10  ;;  %v2762_v23 = vmul.f32 0.5, %v2754_v10 }
 0xb12   : > { %v2769_v13 = vmul.f32 %v2767_v11, %v2759_v7  ;;  %v2766_v14 = vmul.f32 %v2764_v12, %v2754_v10 }
 0xb14   : > { %v2771_v15 = vadd.f32 %v2769_v13, %v2759_v7  ;;  %v2768_v16 = vmul.f32 %v2766_v14, %v2754_v10 }
 0xb16   : > { %v2770_v17 = vadd.f32 %v2768_v16, %v2754_v10  ;;  %v2773_v19 = vmul.f32 0.7978846, %v2771_v15 }
 0xb18   : > { %v2772_v20 = vmul.f32 0.7978846, %v2770_v17  ;;  %3537 = vtanh.f32 %v2773_v19 }
 0xb1a   : > { %3539 = vtanh.f32 %v2772_v20 }
 0xb25   : > { %v3538_v21 = vpop.eup %3537 }
 0xb26   : > { %v2777_v4 = vadd.f32 1.0, %v3538_v21 }
 0xb27   : > { %v3540_v22 = vpop.eup %3539 }
 0xb28   : > { %v2776_v24 = vadd.f32 1.0, %v3540_v22  ;;  %v2779_v26 = vmul.f32 %v2777_v4, %v2763_v25 }
 0xb2a   : > { %v2778_v3 = vmul.f32 %v2776_v24, %v2762_v23 }
 0xb2c   : > { %3445 = vmatprep.mubr.f32.mxu0 %v2778_v3 }
 0xb2d   : > { %3446 = vmatmul.mubr.f32.vlgmr.msra.gmra.mxu0 %v2779_v26 }
 0xbed   : > { %v3447_v28 = vpop.f32.mrf.mxu0 }
 0xbee   : > { %v2856_v29 = vadd.f32 %v3447_v28, %v4109_v18 }
 0xbef   : > { %v2846_v30 = vpop.f32.mrf.mxu0 }
 0xbf0   : > { %v2864_v31 = vadd.f32 %v3214_v27, %v2856_v29  ;;  %v2855_v32 = vadd.f32 %v2846_v30, %v4112_v45  ;;  %2870 = sbr.rel (%p3215_p5) target bundleno = 3743 (0xe9f), region = 112 }
 0xbf2   : > { %2866 = vst.msk [vmem:[#allocation2 + $0x8] sm:$0x3] %vm1037_vm4, %v2864_v31  ;;  %v2863_v33 = vadd.f32 %v3214_v27, %v2855_v32 }
 0xbf4   : > { %2865 = vst.msk [vmem:[#allocation2] sm:$0xff] %vm1033_vm3, %v2863_v33 }
 0xbf5   : > { %v2872_v34 = vrot.slane %v2863_v33, 4  ;;  %vm2874_vm13 = vcmask 1040384   ;;  %v2908_v42 = vld [vmem:[%s4261_s28 + $0x18] sm:$0xff]  ;;  %v3600_v43 = vmov 0.0   ;;  %v2907_v44 = vld [vmem:[%s4261_s28 + $0x10] sm:$0xff]  ;;  %vm3601_vm14 = vmmov 0  }
 0xbf6   : > { %3448 = vmatprep.subr.mxu0 %v3600_v43  ;;  %3456 = vmatprep.mubr.msk.f32.mxu0 %vm3601_vm14, %v3600_v43  ;;  %v2906_v46 = vld [vmem:[%s4261_s28 + $0x8] sm:$0xff]  ;;  %v2905_v47 = vld [vmem:[%s4261_s28] sm:$0xff] }
 0xbf7   : > { %v2875_v35 = vsel %vm2874_vm13, %v2863_v33, %v2872_v34  ;;  %3449 = vmatpush3.msra.mxu0 %v2908_v42  ;;  %v3216_v52 = vld [vmem:[%s4262_s18] ss:$0 sm:$0xff] }
 0xbf8   : > { %v2878_v36 = vsel %vm1037_vm4, %v2875_v35, 0.0  ;;  %3450 = vmatprep.subr.mxu0 %v3600_v43  ;;  %v3217_v53 = vld [vmem:[%s4263_s29] ss:$0 sm:$0xff] }
 0xbf9   : > { %2879 = vadd.xlane.f32.xlu0 %v2878_v36  ;;  %3451 = vmatpush3.msra.mxu0 %v2907_v44 }
 0xbfa   : > { %3452 = vmatprep.subr.mxu0 %v3600_v43 }
 0xbfb   : > { %3453 = vmatpush3.msra.mxu0 %v2906_v46 }
 0xbfc   : > { %3454 = vmatprep.subr.mxu0 %v3600_v43 }
 0xbfd   : > { %3455 = vmatpush3.msra.mxu0 %v2905_v47 }
 0xc82   : > { %v2880_v38 = vpop.xlane.xlu0 %2879 }
 0xc83   : > { %v2881_v18 = vmul.f32 0.03125, %v2880_v38 }
 0xc85   : > { %v2882_v39 = vsub.f32 %v2875_v35, %v2881_v18 }
 0xc87   : > { %v2883_v40 = vmul.f32 %v2882_v39, %v2882_v39 }
 0xc89   : > { %v2884_v45 = vsel %vm1037_vm4, %v2883_v40, 0.0 }
 0xc8a   : > { %2885 = vadd.xlane.f32.xlu0 %v2884_v45 }
 0xd13   : > { %v2886_v48 = vpop.xlane.xlu0 %2885 }
 0xd14   : > { %v2887_v49 = vmul.f32 0.03125, %v2886_v48 }
 0xd16   : > { %v2888_v50 = vadd.f32 1e-05, %v2887_v49 }
 0xd18   : > { %3541 = vrsqrt.f32 %v2888_v50 }
 0xd25   : > { %v3542_v51 = vpop.eup %3541 }
 0xd26   : > { %v2890_v37 = vmul.f32 %v3542_v51, %v2882_v39 }
 0xd28   : > { %v2897_v54 = vmul.f32 %v3216_v52, %v2890_v37 }
 0xd2a   : > { %v2904_v55 = vadd.f32 %v3217_v53, %v2897_v54 }
 0xd2c   : > { %3457 = vmatmul.mubr.msk.f32.vlgmr.msra.gmra.mxu0 %vm1033_vm3, %v2904_v55 }
 0xdec   : > { %v2978_v56 = vpop.f32.mrf.mxu0 }
 0xded   : > { %v2982_v57 = vmul.f32 %v2978_v56, %v2978_v56 }
 0xdee   : > { %v3458_v58 = vpop.f32.mrf.mxu0 }
 0xdef   : > { %v2983_v59 = vsel %vm1037_vm4, %v2982_v57, 0.0 }
 0xdf0   : > { %2984 = vadd.xlane.f32.xlu1 %v2983_v59 }
 0xe79   : > { %v2985_v60 = vpop.xlane.xlu1 %2984 }
 0xe7a   : > { %3543 = vrsqrt.f32 %v2985_v60  ;;  %vm2988_vm15 = vcmp.eq.f32.partialorder %v2985_v60, inf  ;;  %v2991_v62 = vand.u32 2147483648, %v2985_v60  ;;  %vm2990_vm0 = vcmp.eq.f32.partialorder %v2985_v60, 0.0 }
 0xe87   : > { %v3544_v61 = vpop.eup %3543 }
 0xe88   : > { %v2987_v41 = vmul.f32 %v3544_v61, %v2985_v60 }
 0xe8a   : > { %v2989_v63 = vsel %vm2988_vm15, %v2985_v60, %v2987_v41 }
 0xe8b   : > { %v2992_v0 = vsel %vm2990_vm0, %v2991_v62, %v2989_v63 }
 0xe8c   : > { %v2993_v1 = vmax.f32 %v2992_v0, 1e-12 }
 0xe8e   : > { %3545 = vrcp.f32 %v2993_v1 }
 0xe9b   : > { %v3546_v2 = vpop.eup %3545 }
 0xe9c   : > { %v2995_v5 = vmul.f32 %v3546_v2, %v2978_v56 }
 0xe9e   : > { %2996 = vst.msk [vmem:[#allocation3] sm:$0x3] %vm1037_vm4, %v2995_v5 }
 0xe9f PF: > { %p3463_p6 = scmp.eq.s32.totalorder %s3719_s25, 1  ;;  %s3602_s19 = smov [#allocation3]  }
 0xea0   : > { %s3004_s26 = sshll.u32 %s3602_s19, 4  ;;  %s3005_s26 = int_to_ptr.vmem [resolvable:$true] %s3004_s26 }
 0xea1   : > { %s3547_s5 = scalar_lea.vmem %s3005_s26, 32  ;;  %p3554_p10 = scmp.lt.s32.totalorder %s3005_s26, %s3005_s26 }
 0xea2   : > { %p3548_p7 = scmp.ne.s32.totalorder %s3005_s26, %s3547_s5  ;;  %p3555_p11 = scmp.lt.s32.totalorder %s3547_s5, %s3547_s5 }
 0xea4   : > { %p3549_p8 = pnand %p3548_p7, %p3463_p6  ;;  %p3556_p12 = por %p3555_p11, %p3554_p10 }
 0xea6   : > { %p3550_p9 = pneg %p3549_p8 }
 0xea8   : > { %p3557_p13 = pnand %p3556_p12, %p3550_p9 }
 0xeaa   : > { %3560 = shalt.err (!%p3557_p13)
}
 0xeab   : > { %s4264_s27 = sld [smem:[#allocation18_spill]] }
 0xeb1   : > { %3460 = dma.vmem_to_hbm [thread:$0]  (%p3463_p6), %s3005_s26, 32, %s4264_s27, [#allocation4]  }
 0xeb2   : > { %3576 = dma.done.wait (%p3463_p6), [#allocation4], 32  }
 0xeb3   : > { %3578 = vsyncadd (%p3463_p6), [#allocation4], 4294967264 }
 0xeb4 PF: > { %s4265_s22 = sld [smem:[#allocation6_spill]] }
 0xeba   : > { %s32_s2 = sadd.s32 1, %s4265_s22  }
 0xebb   : > { %p29_p0 = scmp.ge.s32.totalorder %s32_s2, 4  }
 0xebd   :  { %31 = sbr.rel (!%p29_p0) target bundleno = 14 (0xe), region = 172 }
 0xec2   :  { %3017 = vsyncpa [#allocation4], 1 }
 0xec3   :  { %3019 = vsyncpa [#allocation4 + $0x1], 1 }

</bundles_post_ra>
